<compile_context>
chip_gen: v5e
topology: v5e:2x2
jax: 0.10.0
libtpu: 0.0.40
codegen_flags: <defaults>
</compile_context>

<pallas_src>
import jax
import jax.numpy as jnp
import numpy as np
from jax.experimental import pallas as pl
from jax.experimental.pallas import tpu as pltpu

GP = 128  # per-gate lane-tile width (gates zero-padded H -> 128 so slices are vreg-aligned)


def lstm_kernel(x_ref, wih_ref, whh_ref, b_ref, wfc_ref, bfc_ref, out_ref):
    # x_ref:   (B, T*I)       bf16  flat batch-major slab (reshape of (B,T,I), no transpose)
    # wih_ref: (T*I, T*4*GP)  bf16  block-diagonal input projection; diag block t = W_ih.T,
    #                               gate order [i, f, o, g], cols [g*128, g*128+H), rest zero
    # whh_ref: (GP, 4*GP)     bf16  recurrent weight, rows >= H zero, same per-gate tiling
    # b_ref:   (1, T*4*GP)    f32   (b_ih + b_hh) tiled per timestep, zero in padded lanes
    # wfc_ref: (1, GP)        f32   final Linear weight, zero-padded
    # bfc_ref: (1, 1)         f32
    # out_ref: (B, 1)         f32
    G4 = 4 * GP
    T = b_ref.shape[1] // G4

    # Hoisted input projection for ALL timesteps as ONE MXU matmul (bias folded
    # in).  The block-diagonal weight puts timestep t's pre-activations in lane
    # tiles [t*512, (t+1)*512) -> every per-step slice below is lane-tile
    # aligned (no XLU rotates inside the serial recurrence).
    x_proj = (jnp.dot(x_ref[...], wih_ref[...],
                      preferred_element_type=jnp.float32)
              + b_ref[...])                                       # (B, T*4*GP) f32

    def gates(pre):
        # pre: (B, 4*GP) f32, lane tiles [i | f | o | g]
        sig = jax.nn.sigmoid(pre[:, :3 * GP])      # one fused EUP pass over i|f|o
        g_g = jnp.tanh(pre[:, 3 * GP:])
        return sig[:, :GP], sig[:, GP:2 * GP], sig[:, 2 * GP:], g_g

    # t = 0 peeled: h0 = c0 = 0, so no recurrent matmul and c = i*g.
    i_g, f_g, o_g, g_g = gates(x_proj[:, :G4])
    c = i_g * g_g
    h = o_g * jnp.tanh(c)

    # Remaining steps: only the (B,128)@(128,512) recurrent GEMM sits on the
    # serial critical path.  Activations / cell state stay f32 (v5e VPU/EUP
    # have no bf16); only the MXU lhs operand h is cast.
    # TODO(synk): hold whh in MXU weight-staging regs (pltpu.matmul_push_rhs /
    # matmul_acc_lhs / matmul_pop) to drop the per-step weight push; needs
    # per-generation (MRF vs MRB) pop-pattern validation.
    for t in range(1, T):
        pre = (x_proj[:, t * G4:(t + 1) * G4]                     # lane-tile aligned slice
               + jnp.dot(h.astype(jnp.bfloat16), whh_ref[...],
                         preferred_element_type=jnp.float32))     # (B, 4*GP)
        i_g, f_g, o_g, g_g = gates(pre)
        c = f_g * c + i_g * g_g
        h = o_g * jnp.tanh(c)

    # Final Linear on the last hidden state via VPU multiply + lane reduction
    # (avoids an N=1 MXU matmul and its drain latency at the tail; padded
    # lanes of h are exactly zero so the reduction is exact).
    out_ref[...] = (jnp.sum(h * wfc_ref[...], axis=-1, keepdims=True)
                    + bfc_ref[...])


def pack_lstm_params(w_ih, w_hh, b_ih, b_hh, w_fc, b_fc, seq_len):
    """PyTorch-layout params -> kernel layout.

    PyTorch: w_ih (4H, I), w_hh (4H, H), b_* (4H,), fc w (1, H), fc b (1,),
             gate order [i, f, g, o].
    Kernel:  gate order [i, f, o, g], each gate padded to its own 128-lane
             tile; input projection expanded to a block-diagonal (T*I, T*512)
             weight so the whole sequence is projected by one matmul on a
             contiguous (B, T*I) reshape of x (no host transpose needed).
    """
    H = w_hh.shape[1]
    I = w_ih.shape[1]
    T = seq_len
    w_ih = np.asarray(w_ih, np.float32)
    w_hh = np.asarray(w_hh, np.float32)
    bsum = np.asarray(b_ih, np.float32) + np.asarray(b_hh, np.float32)

    # PyTorch gate row-blocks [i, f, g, o] -> kernel gate tiles [i, f, o, g].
    gate_rows = [slice(0, H), slice(H, 2 * H), slice(3 * H, 4 * H), slice(2 * H, 3 * H)]

    wih_core = np.zeros((I, 4 * GP), np.float32)
    whh_pad = np.zeros((GP, 4 * GP), np.float32)
    b_core = np.zeros((4 * GP,), np.float32)
    for g, rows in enumerate(gate_rows):
        wih_core[:, g * GP:g * GP + H] = w_ih[rows].T
        whh_pad[:H, g * GP:g * GP + H] = w_hh[rows].T
        b_core[g * GP:g * GP + H] = bsum[rows]

    # Block-diagonal input-projection weight: all T timesteps in one MXU matmul,
    # each timestep's output in its own 4*128-lane tile group.
    wih_big = np.zeros((T * I, T * 4 * GP), np.float32)
    for t in range(T):
        wih_big[t * I:(t + 1) * I, t * 4 * GP:(t + 1) * 4 * GP] = wih_core
    b_big = np.tile(b_core, T).reshape(1, T * 4 * GP)

    wfc = np.zeros((1, GP), np.float32)
    wfc[0, :H] = np.asarray(w_fc, np.float32).reshape(H)
    bfc = np.asarray(b_fc, np.float32).reshape(1, 1)

    return (jnp.asarray(wih_big, jnp.bfloat16),
            jnp.asarray(whh_pad, jnp.bfloat16),
            jnp.asarray(b_big, jnp.float32),
            jnp.asarray(wfc, jnp.float32),
            jnp.asarray(bfc, jnp.float32))


@jax.jit
def lstm_forward(x, wih, whh, b, wfc, bfc):
    B, T, I = x.shape
    # Contiguous reshape (no transpose, no copy) + bf16 cast; the block-diagonal
    # wih makes per-timestep indexing lane-aligned without a time-major slab.
    x_flat = x.reshape(B, T * I).astype(jnp.bfloat16)

    flops = 2 * B * (T * I) * (T * 4 * GP) + 2 * (T - 1) * B * GP * (4 * GP)
    transcendentals = 5 * T * B * GP          # sigmoid over 3 tiles + tanh(g) + tanh(c)
    bytes_accessed = (x_flat.size * 2 + wih.size * 2 + whh.size * 2
                      + b.size * 4 + wfc.size * 4 + bfc.size * 4 + B * 4)

    vmem = pl.BlockSpec(memory_space=pltpu.MemorySpace.VMEM)
    return pl.pallas_call(
        lstm_kernel,
        out_shape=jax.ShapeDtypeStruct((B, 1), jnp.float32),
        in_specs=[vmem] * 6,
        out_specs=vmem,
        cost_estimate=pl.CostEstimate(flops=int(flops),
                                      transcendentals=int(transcendentals),
                                      bytes_accessed=int(bytes_accessed)),
    )(x_flat, wih, whh, b, wfc, bfc)


def lstm_reference(x, w_ih, w_hh, b_ih, b_hh, w_fc, b_fc):
    """Pure-JAX f32 reference matching PyTorch nn.LSTM(batch_first) + nn.Linear."""
    B, T, _ = x.shape
    H = w_hh.shape[1]
    h = jnp.zeros((B, H), jnp.float32)
    c = jnp.zeros((B, H), jnp.float32)
    for t in range(T):
        g = x[:, t, :] @ w_ih.T + h @ w_hh.T + b_ih + b_hh   # (B, 4H), [i,f,g,o]
        i_g = jax.nn.sigmoid(g[:, :H])
        f_g = jax.nn.sigmoid(g[:, H:2 * H])
        g_g = jnp.tanh(g[:, 2 * H:3 * H])
        o_g = jax.nn.sigmoid(g[:, 3 * H:])
        c = f_g * c + i_g * g_g
        h = o_g * jnp.tanh(c)
    return h @ w_fc.T + b_fc


if __name__ == "__main__":
    hidden_size = 20
    input_size = 10
    output_size = 1
    batch_size = 16
    sequence_length = 5

    key = jax.random.PRNGKey(0)
    kx, k1, k2, k3, k4, k5, k6 = jax.random.split(key, 7)

    # Deterministic PyTorch-layout parameters, uniform(-1/sqrt(H), 1/sqrt(H)),
    # gate order [i, f, g, o] (PyTorch convention).
    bound = 1.0 / np.sqrt(hidden_size)
    x = jax.random.normal(kx, (batch_size, sequence_length, input_size), jnp.float32)
    w_ih = jax.random.uniform(k1, (4 * hidden_size, input_size), jnp.float32, -bound, bound)
    w_hh = jax.random.uniform(k2, (4 * hidden_size, hidden_size), jnp.float32, -bound, bound)
    b_ih = jax.random.uniform(k3, (4 * hidden_size,), jnp.float32, -bound, bound)
    b_hh = jax.random.uniform(k4, (4 * hidden_size,), jnp.float32, -bound, bound)
    w_fc = jax.random.uniform(k5, (output_size, hidden_size), jnp.float32, -bound, bound)
    b_fc = jax.random.uniform(k6, (output_size,), jnp.float32, -bound, bound)

    wih, whh, b, wfc, bfc = pack_lstm_params(w_ih, w_hh, b_ih, b_hh, w_fc, b_fc,
                                             sequence_length)

    out = lstm_forward(x, wih, whh, b, wfc, bfc)
    jax.block_until_ready(out)

    ref = lstm_reference(x, w_ih, w_hh, b_ih, b_hh, w_fc, b_fc)
    # bf16 matmul operands (f32 accumulation) -> looser tolerance than pure f32.
    np.testing.assert_allclose(np.asarray(out), np.asarray(ref), rtol=2e-2, atol=2e-2)

    print("KERNEL_OK")
</pallas_src>

<mosaic_0001>
module attributes {stable_mosaic.version = 11 : i64} {
  func.func @lstm_kernel(%arg0: memref<16x50xbf16, #tpu.memory_space<vmem>>, %arg1: memref<50x2560xbf16, #tpu.memory_space<vmem>>, %arg2: memref<128x512xbf16, #tpu.memory_space<vmem>>, %arg3: memref<1x2560xf32, #tpu.memory_space<vmem>>, %arg4: memref<1x128xf32, #tpu.memory_space<vmem>>, %arg5: memref<1x1xf32, #tpu.memory_space<vmem>>, %arg6: memref<16x1xf32, #tpu.memory_space<vmem>>) attributes {dimension_semantics = [], scalar_prefetch = 0 : i64, scratch_operands = 0 : i64, tpu.core_type = #tpu.core_type<tc>} {
    %c0 = arith.constant 0 : index
    %c0_0 = arith.constant 0 : index
    %0 = vector.load %arg0[%c0, %c0_0] : memref<16x50xbf16, #tpu.memory_space<vmem>>, vector<16x50xbf16>
    %c0_1 = arith.constant 0 : index
    %c0_2 = arith.constant 0 : index
    %1 = vector.load %arg1[%c0_1, %c0_2] : memref<50x2560xbf16, #tpu.memory_space<vmem>>, vector<50x2560xbf16>
    %cst = arith.constant dense<0.000000e+00> : vector<16x2560xf32>
    %2 = tpu.matmul %0, %1, %cst {dimension_numbers = #tpu.dot_dimension_numbers<[1], [0], [0], [1], [0, 0, 1, 1], [], []>} : vector<16x50xbf16>, vector<50x2560xbf16>, vector<16x2560xf32> -> vector<16x2560xf32>
    %c0_3 = arith.constant 0 : index
    %c0_4 = arith.constant 0 : index
    %3 = vector.load %arg3[%c0_3, %c0_4] : memref<1x2560xf32, #tpu.memory_space<vmem>>, vector<1x2560xf32>
    %4 = vector.broadcast %3 : vector<1x2560xf32> to vector<16x2560xf32>
    %5 = arith.addf %2, %4 : vector<16x2560xf32>
    %6 = vector.extract_strided_slice %5 {offsets = [0, 0], sizes = [16, 512], strides = [1, 1]} : vector<16x2560xf32> to vector<16x512xf32>
    %7 = vector.extract_strided_slice %6 {offsets = [0, 0], sizes = [16, 384], strides = [1, 1]} : vector<16x512xf32> to vector<16x384xf32>
    %8 = arith.negf %7 : vector<16x384xf32>
    %9 = math.exp %8 : vector<16x384xf32>
    %cst_5 = arith.constant 1.000000e+00 : f32
    %10 = vector.broadcast %cst_5 : f32 to vector<16x384xf32>
    %11 = arith.addf %10, %9 : vector<16x384xf32>
    %12 = arith.divf %10, %11 : vector<16x384xf32>
    %13 = vector.extract_strided_slice %6 {offsets = [0, 384], sizes = [16, 128], strides = [1, 1]} : vector<16x512xf32> to vector<16x128xf32>
    %14 = math.tanh %13 : vector<16x128xf32>
    %15 = vector.extract_strided_slice %12 {offsets = [0, 0], sizes = [16, 128], strides = [1, 1]} : vector<16x384xf32> to vector<16x128xf32>
    %16 = vector.extract_strided_slice %12 {offsets = [0, 256], sizes = [16, 128], strides = [1, 1]} : vector<16x384xf32> to vector<16x128xf32>
    %17 = arith.mulf %15, %14 : vector<16x128xf32>
    %18 = math.tanh %17 : vector<16x128xf32>
    %19 = arith.mulf %16, %18 : vector<16x128xf32>
    %20 = vector.extract_strided_slice %5 {offsets = [0, 512], sizes = [16, 512], strides = [1, 1]} : vector<16x2560xf32> to vector<16x512xf32>
    %21 = arith.truncf %19 : vector<16x128xf32> to vector<16x128xbf16>
    %c0_6 = arith.constant 0 : index
    %c0_7 = arith.constant 0 : index
    %22 = vector.load %arg2[%c0_6, %c0_7] : memref<128x512xbf16, #tpu.memory_space<vmem>>, vector<128x512xbf16>
    %cst_8 = arith.constant dense<0.000000e+00> : vector<16x512xf32>
    %23 = tpu.matmul %21, %22, %cst_8 {dimension_numbers = #tpu.dot_dimension_numbers<[1], [0], [0], [1], [0, 0, 1, 1], [], []>} : vector<16x128xbf16>, vector<128x512xbf16>, vector<16x512xf32> -> vector<16x512xf32>
    %24 = arith.addf %20, %23 : vector<16x512xf32>
    %25 = vector.extract_strided_slice %24 {offsets = [0, 0], sizes = [16, 384], strides = [1, 1]} : vector<16x512xf32> to vector<16x384xf32>
    %26 = arith.negf %25 : vector<16x384xf32>
    %27 = math.exp %26 : vector<16x384xf32>
    %cst_9 = arith.constant 1.000000e+00 : f32
    %28 = vector.broadcast %cst_9 : f32 to vector<16x384xf32>
    %29 = arith.addf %28, %27 : vector<16x384xf32>
    %30 = arith.divf %28, %29 : vector<16x384xf32>
    %31 = vector.extract_strided_slice %24 {offsets = [0, 384], sizes = [16, 128], strides = [1, 1]} : vector<16x512xf32> to vector<16x128xf32>
    %32 = math.tanh %31 : vector<16x128xf32>
    %33 = vector.extract_strided_slice %30 {offsets = [0, 0], sizes = [16, 128], strides = [1, 1]} : vector<16x384xf32> to vector<16x128xf32>
    %34 = vector.extract_strided_slice %30 {offsets = [0, 128], sizes = [16, 128], strides = [1, 1]} : vector<16x384xf32> to vector<16x128xf32>
    %35 = vector.extract_strided_slice %30 {offsets = [0, 256], sizes = [16, 128], strides = [1, 1]} : vector<16x384xf32> to vector<16x128xf32>
    %36 = arith.mulf %34, %17 : vector<16x128xf32>
    %37 = arith.mulf %33, %32 : vector<16x128xf32>
    %38 = arith.addf %36, %37 : vector<16x128xf32>
    %39 = math.tanh %38 : vector<16x128xf32>
    %40 = arith.mulf %35, %39 : vector<16x128xf32>
    %41 = vector.extract_strided_slice %5 {offsets = [0, 1024], sizes = [16, 512], strides = [1, 1]} : vector<16x2560xf32> to vector<16x512xf32>
    %42 = arith.truncf %40 : vector<16x128xf32> to vector<16x128xbf16>
    %c0_10 = arith.constant 0 : index
    %c0_11 = arith.constant 0 : index
    %43 = vector.load %arg2[%c0_10, %c0_11] : memref<128x512xbf16, #tpu.memory_space<vmem>>, vector<128x512xbf16>
    %cst_12 = arith.constant dense<0.000000e+00> : vector<16x512xf32>
    %44 = tpu.matmul %42, %43, %cst_12 {dimension_numbers = #tpu.dot_dimension_numbers<[1], [0], [0], [1], [0, 0, 1, 1], [], []>} : vector<16x128xbf16>, vector<128x512xbf16>, vector<16x512xf32> -> vector<16x512xf32>
    %45 = arith.addf %41, %44 : vector<16x512xf32>
    %46 = vector.extract_strided_slice %45 {offsets = [0, 0], sizes = [16, 384], strides = [1, 1]} : vector<16x512xf32> to vector<16x384xf32>
    %47 = arith.negf %46 : vector<16x384xf32>
    %48 = math.exp %47 : vector<16x384xf32>
    %cst_13 = arith.constant 1.000000e+00 : f32
    %49 = vector.broadcast %cst_13 : f32 to vector<16x384xf32>
    %50 = arith.addf %49, %48 : vector<16x384xf32>
    %51 = arith.divf %49, %50 : vector<16x384xf32>
    %52 = vector.extract_strided_slice %45 {offsets = [0, 384], sizes = [16, 128], strides = [1, 1]} : vector<16x512xf32> to vector<16x128xf32>
    %53 = math.tanh %52 : vector<16x128xf32>
    %54 = vector.extract_strided_slice %51 {offsets = [0, 0], sizes = [16, 128], strides = [1, 1]} : vector<16x384xf32> to vector<16x128xf32>
    %55 = vector.extract_strided_slice %51 {offsets = [0, 128], sizes = [16, 128], strides = [1, 1]} : vector<16x384xf32> to vector<16x128xf32>
    %56 = vector.extract_strided_slice %51 {offsets = [0, 256], sizes = [16, 128], strides = [1, 1]} : vector<16x384xf32> to vector<16x128xf32>
    %57 = arith.mulf %55, %38 : vector<16x128xf32>
    %58 = arith.mulf %54, %53 : vector<16x128xf32>
    %59 = arith.addf %57, %58 : vector<16x128xf32>
    %60 = math.tanh %59 : vector<16x128xf32>
    %61 = arith.mulf %56, %60 : vector<16x128xf32>
    %62 = vector.extract_strided_slice %5 {offsets = [0, 1536], sizes = [16, 512], strides = [1, 1]} : vector<16x2560xf32> to vector<16x512xf32>
    %63 = arith.truncf %61 : vector<16x128xf32> to vector<16x128xbf16>
    %c0_14 = arith.constant 0 : index
    %c0_15 = arith.constant 0 : index
    %64 = vector.load %arg2[%c0_14, %c0_15] : memref<128x512xbf16, #tpu.memory_space<vmem>>, vector<128x512xbf16>
    %cst_16 = arith.constant dense<0.000000e+00> : vector<16x512xf32>
    %65 = tpu.matmul %63, %64, %cst_16 {dimension_numbers = #tpu.dot_dimension_numbers<[1], [0], [0], [1], [0, 0, 1, 1], [], []>} : vector<16x128xbf16>, vector<128x512xbf16>, vector<16x512xf32> -> vector<16x512xf32>
    %66 = arith.addf %62, %65 : vector<16x512xf32>
    %67 = vector.extract_strided_slice %66 {offsets = [0, 0], sizes = [16, 384], strides = [1, 1]} : vector<16x512xf32> to vector<16x384xf32>
    %68 = arith.negf %67 : vector<16x384xf32>
    %69 = math.exp %68 : vector<16x384xf32>
    %cst_17 = arith.constant 1.000000e+00 : f32
    %70 = vector.broadcast %cst_17 : f32 to vector<16x384xf32>
    %71 = arith.addf %70, %69 : vector<16x384xf32>
    %72 = arith.divf %70, %71 : vector<16x384xf32>
    %73 = vector.extract_strided_slice %66 {offsets = [0, 384], sizes = [16, 128], strides = [1, 1]} : vector<16x512xf32> to vector<16x128xf32>
    %74 = math.tanh %73 : vector<16x128xf32>
    %75 = vector.extract_strided_slice %72 {offsets = [0, 0], sizes = [16, 128], strides = [1, 1]} : vector<16x384xf32> to vector<16x128xf32>
    %76 = vector.extract_strided_slice %72 {offsets = [0, 128], sizes = [16, 128], strides = [1, 1]} : vector<16x384xf32> to vector<16x128xf32>
    %77 = vector.extract_strided_slice %72 {offsets = [0, 256], sizes = [16, 128], strides = [1, 1]} : vector<16x384xf32> to vector<16x128xf32>
    %78 = arith.mulf %76, %59 : vector<16x128xf32>
    %79 = arith.mulf %75, %74 : vector<16x128xf32>
    %80 = arith.addf %78, %79 : vector<16x128xf32>
    %81 = math.tanh %80 : vector<16x128xf32>
    %82 = arith.mulf %77, %81 : vector<16x128xf32>
    %83 = vector.extract_strided_slice %5 {offsets = [0, 2048], sizes = [16, 512], strides = [1, 1]} : vector<16x2560xf32> to vector<16x512xf32>
    %84 = arith.truncf %82 : vector<16x128xf32> to vector<16x128xbf16>
    %c0_18 = arith.constant 0 : index
    %c0_19 = arith.constant 0 : index
    %85 = vector.load %arg2[%c0_18, %c0_19] : memref<128x512xbf16, #tpu.memory_space<vmem>>, vector<128x512xbf16>
    %cst_20 = arith.constant dense<0.000000e+00> : vector<16x512xf32>
    %86 = tpu.matmul %84, %85, %cst_20 {dimension_numbers = #tpu.dot_dimension_numbers<[1], [0], [0], [1], [0, 0, 1, 1], [], []>} : vector<16x128xbf16>, vector<128x512xbf16>, vector<16x512xf32> -> vector<16x512xf32>
    %87 = arith.addf %83, %86 : vector<16x512xf32>
    %88 = vector.extract_strided_slice %87 {offsets = [0, 0], sizes = [16, 384], strides = [1, 1]} : vector<16x512xf32> to vector<16x384xf32>
    %89 = arith.negf %88 : vector<16x384xf32>
    %90 = math.exp %89 : vector<16x384xf32>
    %cst_21 = arith.constant 1.000000e+00 : f32
    %91 = vector.broadcast %cst_21 : f32 to vector<16x384xf32>
    %92 = arith.addf %91, %90 : vector<16x384xf32>
    %93 = arith.divf %91, %92 : vector<16x384xf32>
    %94 = vector.extract_strided_slice %87 {offsets = [0, 384], sizes = [16, 128], strides = [1, 1]} : vector<16x512xf32> to vector<16x128xf32>
    %95 = math.tanh %94 : vector<16x128xf32>
    %96 = vector.extract_strided_slice %93 {offsets = [0, 0], sizes = [16, 128], strides = [1, 1]} : vector<16x384xf32> to vector<16x128xf32>
    %97 = vector.extract_strided_slice %93 {offsets = [0, 128], sizes = [16, 128], strides = [1, 1]} : vector<16x384xf32> to vector<16x128xf32>
    %98 = vector.extract_strided_slice %93 {offsets = [0, 256], sizes = [16, 128], strides = [1, 1]} : vector<16x384xf32> to vector<16x128xf32>
    %99 = arith.mulf %97, %80 : vector<16x128xf32>
    %100 = arith.mulf %96, %95 : vector<16x128xf32>
    %101 = arith.addf %99, %100 : vector<16x128xf32>
    %102 = math.tanh %101 : vector<16x128xf32>
    %103 = arith.mulf %98, %102 : vector<16x128xf32>
    %c0_22 = arith.constant 0 : index
    %c0_23 = arith.constant 0 : index
    %104 = vector.load %arg4[%c0_22, %c0_23] : memref<1x128xf32, #tpu.memory_space<vmem>>, vector<1x128xf32>
    %105 = vector.broadcast %104 : vector<1x128xf32> to vector<16x128xf32>
    %106 = arith.mulf %103, %105 : vector<16x128xf32>
    %cst_24 = arith.constant dense<0.000000e+00> : vector<16xf32>
    %107 = vector.multi_reduction <add>, %106, %cst_24 [1] : vector<16x128xf32> to vector<16xf32>
    %108 = vector.shape_cast %107 : vector<16xf32> to vector<16x1xf32>
    %c0_25 = arith.constant 0 : index
    %c0_26 = arith.constant 0 : index
    %109 = vector.load %arg5[%c0_25, %c0_26] : memref<1x1xf32, #tpu.memory_space<vmem>>, vector<1x1xf32>
    %110 = vector.broadcast %109 : vector<1x1xf32> to vector<16x1xf32>
    %111 = arith.addf %108, %110 : vector<16x1xf32>
    %c0_27 = arith.constant 0 : index
    %c0_28 = arith.constant 0 : index
    %112 = vector.load %arg6[%c0_27, %c0_28] : memref<16x1xf32, #tpu.memory_space<vmem>>, vector<16x1xf32>
    tpu.vector_store %arg6[%c0_27, %c0_28], %111 {strides = array<i32>} : memref<16x1xf32, #tpu.memory_space<vmem>>, vector<16x1xf32>,
    return
  }
}

</mosaic_0001>

<bundles_post_ra>
// kernel: lstm_forward.1
= control target key start
LH: loop header
LB: loop body
LE: loop exit
PB: predicated region body
PF: predicated region fallthrough
CT: control target
= control target key end

     0   :  { %s3519_s0 = inlined_call_operand.vmem [shape: bf16[16,50], index: 0, kind: input, shape index: {}]   ;;  %s3520_s1 = inlined_call_operand.hbm [shape: bf16[50,2560], index: 1, kind: input, shape index: {}]   ;;  %s3521_s2 = inlined_call_operand.vmem [shape: bf16[128,512], index: 2, kind: input, shape index: {}]   ;;  %s3522_s3 = inlined_call_operand.vmem [shape: f32[1,2560], index: 3, kind: input, shape index: {}]   ;;  %s3523_s4 = inlined_call_operand.vmem [shape: f32[1,128], index: 4, kind: input, shape index: {}]   ;;  %s3524_s5 = inlined_call_operand.<no memory space> [shape: f32[1,1], index: 5, kind: input, shape index: {}]   ;;  %s3525_s6 = inlined_call_operand.vmem [shape: f32[16,1], index: 6, kind: output, shape index: {}]  }
   0x1   :  { %v11_v0 = vstv %s3524_s5 }
   0x2   :  { %12 = vst [vmem:[#allocation2] sm:$0x1] %v11_v0 }
   0x3   :  { %13 = vsyncpa [#allocation4], 0  ;;  %s20_s25 = sshll.u32 %s3520_s1, 4  ;;  %s2571_s26 = smov [#allocation3]   ;;  %s21_s25 = int_to_ptr.hbm [resolvable:$true] %s20_s25 }
   0x4   :  { %s22_s27 = sshll.u32 %s2571_s26, 4  ;;  %s2572_s28 = smov 1280   ;;  %s23_s27 = int_to_ptr.vmem [resolvable:$true] %s22_s27 }
   0x5   :  { %s2573_s29 = smov 80  }
   0x6   :  { %28 = dma.hbm_to_vmem [thread:$0]  %s21_s25, 8960, %s23_s27, [#allocation4], %s2572_s28, %s2572_s28, %s2573_s29  }
   0x7   :  { %2569 = dma.done.wait [#allocation4], 8960  }
   0x8   :  { %2570 = vsyncadd [#allocation4], 4294958336  ;;  %v104_v1 = vld [vmem:[#allocation3 + $0x1e0] sm:$0x1]  ;;  %v105_v2 = vld [vmem:[#allocation3 + $0x1e8] sm:$0x11] }
   0x9   :  { %v347_v3 = vunpack.c.l.b16 %v104_v1  ;;  %v348_v4 = vunpack.c.l.b16 %v105_v2  ;;  %v349_v5 = vunpack.c.h.b16 %v105_v2  ;;  %vm503_vm0 = vcmask 1040384   ;;  %v2049_v6 = vld [vmem:[#allocation3 + $0x140] sm:$0xf]  ;;  %v2346_v9 = vld [vmem:[#allocation3 + $0x18c] sm:$0xf0] }
   0xa   :  { %v2053_v10 = vld [vmem:[#allocation3 + $0x148] sm:$0xf]  ;;  %v2347_v11 = vld [vmem:[#allocation3 + $0x194] sm:$0xf0]  ;;  %v2337_v13 = vld [vmem:[#allocation3 + $0x14c] sm:$0xf]  ;;  %v2050_v18 = vor.u32 %v2346_v9, %v2049_v6 }
   0xb   :  { %v423_v7 = vpack.c.b16 %v347_v3, %v347_v3  ;;  %v424_v8 = vpack.c.b16 %v348_v4, %v348_v4  ;;  %v425_v12 = vpack.c.b16 %v349_v5, %v349_v5  ;;  %v2055_v14 = vld [vmem:[#allocation3 + $0x198] sm:$0xf0]  ;;  %v2054_v19 = vor.u32 %v2347_v11, %v2053_v10  ;;  %v1973_v20 = vld [vmem:[#allocation3 + $0xa0] sm:$0xf]  ;;  %v2327_v21 = vld [vmem:[#allocation3 + $0xec] sm:$0xf0] }
   0xc   :  { %v1977_v22 = vld [vmem:[#allocation3 + $0xa8] sm:$0xf]  ;;  %v2328_v23 = vld [vmem:[#allocation3 + $0xf4] sm:$0xf0]  ;;  %v2058_v24 = vor.u32 %v2337_v13, %v2055_v14  ;;  %v106_v25 = vld [vmem:[#allocation3 + $0x1f0] sm:$0x11]  ;;  %v1974_v33 = vor.u32 %v2327_v21, %v1973_v20 }
   0xd   :  { %v505_v15 = vsel %vm503_vm0, %v423_v7, 0  ;;  %v508_v16 = vsel %vm503_vm0, %v424_v8, 0  ;;  %v511_v17 = vsel %vm503_vm0, %v425_v12, 0  ;;  %v2318_v26 = vld [vmem:[#allocation3 + $0xac] sm:$0xf]  ;;  %v350_v28 = vunpack.c.l.b16 %v106_v25  ;;  %v2622_v58 = vld [vmem:[%s3519_s0] sm:$0xff] }
   0xe   :  { %565 = vmatpush.bf16.msra.mxu0 %v505_v15  ;;  %579 = vmatpush.bf16.msra.mxu1 %v508_v16  ;;  %v1979_v27 = vld [vmem:[#allocation3 + $0xf8] sm:$0xf0]  ;;  %v351_v29 = vunpack.c.h.b16 %v106_v25  ;;  %v1978_v34 = vor.u32 %v2328_v23, %v1977_v22  ;;  %v1897_v35 = vld [vmem:[#allocation3] sm:$0xf]  ;;  %v2061_v37 = vld [vmem:[#allocation3 + $0x150] sm:$0xf] }
   0xf   :  { %593 = vmatpush.bf16.msra.mxu2 %v511_v17  ;;  %v107_v30 = vld [vmem:[#allocation3 + $0x1f8] sm:$0x11]  ;;  %v426_v36 = vpack.c.b16 %v350_v28, %v350_v28  ;;  %v2348_v38 = vld [vmem:[#allocation3 + $0x19c] sm:$0xf0]  ;;  %v2308_v39 = vld [vmem:[#allocation3 + $0x4c] sm:$0xf0]  ;;  %v1982_v42 = vor.u32 %v2318_v26, %v1979_v27 }
  0x10   :  { %v352_v31 = vunpack.c.l.b16 %v107_v30  ;;  %v353_v32 = vunpack.c.h.b16 %v107_v30  ;;  %v1901_v40 = vld [vmem:[#allocation3 + $0x8] sm:$0xf]  ;;  %v2309_v41 = vld [vmem:[#allocation3 + $0x54] sm:$0xf0]  ;;  %v2299_v43 = vld [vmem:[#allocation3 + $0xc] sm:$0xf]  ;;  %v427_v46 = vpack.c.b16 %v351_v29, %v351_v29  ;;  %v2062_v47 = vor.u32 %v2348_v38, %v2061_v37 }
  0x11   :  { %v1903_v44 = vld [vmem:[#allocation3 + $0x58] sm:$0xf0]  ;;  %v514_v45 = vsel %vm503_vm0, %v426_v36, 0  ;;  %v1898_v50 = vor.u32 %v2308_v39, %v1897_v35  ;;  %v1902_v51 = vor.u32 %v2309_v41, %v1901_v40  ;;  %v1985_v52 = vld [vmem:[#allocation3 + $0xb0] sm:$0xf]  ;;  %vm499_vm1 = vcmask 408576  }
  0x12   :  { %566 = vmatpush.bf16.msra.mxu0 %v2050_v18  ;;  %580 = vmatpush.bf16.msra.mxu1 %v2054_v19  ;;  %v428_v48 = vpack.c.b16 %v352_v31, %v352_v31  ;;  %v429_v49 = vpack.c.b16 %v353_v32, %v353_v32  ;;  %v2329_v53 = vld [vmem:[#allocation3 + $0xfc] sm:$0xf0]  ;;  %v1906_v54 = vor.u32 %v2299_v43, %v1903_v44  ;;  %v2338_v55 = vld [vmem:[#allocation3 + $0x154] sm:$0xf]  ;;  %v2063_v56 = vld [vmem:[#allocation3 + $0x1a0] sm:$0xf0] }
  0x13   :  { %594 = vmatpush.bf16.msra.mxu2 %v2058_v24  ;;  %607 = vmatpush.bf16.msra.mxu3 %v514_v45  ;;  %v2069_v57 = vld [vmem:[#allocation3 + $0x158] sm:$0xf]  ;;  %v517_v59 = vsel %vm503_vm0, %v427_v46, 0  ;;  %v2349_v60 = vld [vmem:[#allocation3 + $0x1a4] sm:$0xf0]  ;;  %v1986_v3 = vor.u32 %v2329_v53, %v1985_v52  ;;  %v2066_v4 = vor.u32 %v2338_v55, %v2063_v56 }
  0x14   :  { %v108_v61 = vld [vmem:[#allocation3 + $0x200] sm:$0x11]  ;;  %v520_v62 = vsel %vm503_vm0, %v428_v48, 0  ;;  %v523_v63 = vsel %vm503_vm0, %v429_v49, 0  ;;  %v2339_v0 = vld [vmem:[#allocation3 + $0x15c] sm:$0xf]  ;;  %v2070_v8 = vor.u32 %v2349_v60, %v2069_v57 }
  0x15   :  { %v2071_v1 = vld [vmem:[#allocation3 + $0x1a8] sm:$0xf0]  ;;  %v354_v2 = vunpack.c.l.b16 %v108_v61  ;;  %v1909_v5 = vld [vmem:[#allocation3 + $0x10] sm:$0xf]  ;;  %v2310_v6 = vld [vmem:[#allocation3 + $0x5c] sm:$0xf0]  ;;  %v355_v18 = vunpack.c.h.b16 %v108_v61 }
  0x16   :  { %567 = vmatpush.bf16.msra.mxu0 %v1974_v33  ;;  %581 = vmatpush.bf16.msra.mxu1 %v1978_v34  ;;  %v109_v7 = vld [vmem:[#allocation3 + $0x208] sm:$0x11]  ;;  %v2074_v9 = vor.u32 %v2339_v0, %v2071_v1  ;;  %v2319_v10 = vld [vmem:[#allocation3 + $0xb4] sm:$0xf]  ;;  %v1987_v11 = vld [vmem:[#allocation3 + $0x100] sm:$0xf0]  ;;  %v1910_v17 = vor.u32 %v2310_v6, %v1909_v5 }
  0x17   :  { %595 = vmatpush.bf16.msra.mxu2 %v1982_v42  ;;  %608 = vmatpush.bf16.msra.mxu3 %v2062_v47  ;;  %v1993_v12 = vld [vmem:[#allocation3 + $0xb8] sm:$0xf]  ;;  %v430_v13 = vpack.c.b16 %v354_v2, %v354_v2  ;;  %v2330_v14 = vld [vmem:[#allocation3 + $0x104] sm:$0xf0]  ;;  %v2320_v15 = vld [vmem:[#allocation3 + $0xbc] sm:$0xf]  ;;  %v356_v19 = vunpack.c.l.b16 %v109_v7  ;;  %v1990_v20 = vor.u32 %v2319_v10, %v1987_v11  ;;  %v357_v24 = vunpack.c.h.b16 %v109_v7 }
  0x18   :  { %v1995_v16 = vld [vmem:[#allocation3 + $0x108] sm:$0xf0]  ;;  %v2300_v21 = vld [vmem:[#allocation3 + $0x14] sm:$0xf]  ;;  %v1911_v22 = vld [vmem:[#allocation3 + $0x60] sm:$0xf0]  ;;  %v1994_v25 = vor.u32 %v2330_v14, %v1993_v12  ;;  %v431_v33 = vpack.c.b16 %v355_v18, %v355_v18 }
  0x19   :  { %v1917_v23 = vld [vmem:[#allocation3 + $0x18] sm:$0xf]  ;;  %v1998_v26 = vor.u32 %v2320_v15, %v1995_v16  ;;  %v526_v27 = vsel %vm503_vm0, %v430_v13, 0  ;;  %v2077_v28 = vld [vmem:[#allocation3 + $0x160] sm:$0xf]  ;;  %v432_v34 = vpack.c.b16 %v356_v19, %v356_v19  ;;  %v1914_v35 = vor.u32 %v2300_v21, %v1911_v22 }
  0x1a   :  { %568 = vmatpush.bf16.msra.mxu0 %v1898_v50  ;;  %582 = vmatpush.bf16.msra.mxu1 %v1902_v51  ;;  %v2350_v29 = vld [vmem:[#allocation3 + $0x1ac] sm:$0xf0]  ;;  %v2311_v30 = vld [vmem:[#allocation3 + $0x64] sm:$0xf0]  ;;  %v2301_v31 = vld [vmem:[#allocation3 + $0x1c] sm:$0xf]  ;;  %v433_v36 = vpack.c.b16 %v357_v24, %v357_v24 }
  0x1b   :  { %596 = vmatpush.bf16.msra.mxu2 %v1906_v54  ;;  %609 = vmatpush.bf16.msra.mxu3 %v1986_v3  ;;  %v1919_v32 = vld [vmem:[#allocation3 + $0x68] sm:$0xf0]  ;;  %v2078_v37 = vor.u32 %v2350_v29, %v2077_v28  ;;  %v110_v38 = vld [vmem:[#allocation3 + $0x210] sm:$0x11]  ;;  %v1918_v39 = vor.u32 %v2311_v30, %v1917_v23  ;;  %v2001_v41 = vld [vmem:[#allocation3 + $0xc0] sm:$0xf] }
  0x1c   :  { %v1922_v40 = vor.u32 %v2301_v31, %v1919_v32  ;;  %v2331_v42 = vld [vmem:[#allocation3 + $0x10c] sm:$0xf0]  ;;  %v2340_v43 = vld [vmem:[#allocation3 + $0x164] sm:$0xf]  ;;  %v2079_v44 = vld [vmem:[#allocation3 + $0x1b0] sm:$0xf0]  ;;  %v358_v49 = vunpack.c.l.b16 %v110_v38  ;;  %v359_v5 = vunpack.c.h.b16 %v110_v38 }
  0x1d   :  { %2123 = vmatmul.msk.bf16.vlgmr.msra.gmra.mxu0 %vm499_vm1, %v2622_v58  ;;  %2124 = vmatmul.msk.bf16.vlgmr.msra.gmra.mxu1 %vm499_vm1, %v2622_v58  ;;  %v2085_v45 = vld [vmem:[#allocation3 + $0x168] sm:$0xf]  ;;  %v529_v46 = vsel %vm503_vm0, %v431_v33, 0  ;;  %v532_v47 = vsel %vm503_vm0, %v432_v34, 0  ;;  %v2351_v48 = vld [vmem:[#allocation3 + $0x1b4] sm:$0xf0]  ;;  %v2002_v53 = vor.u32 %v2331_v42, %v2001_v41 }
  0x1e   :  { %621 = vmatpush.bf16.msrb.mxu0 %v517_v59  ;;  %635 = vmatpush.bf16.msrb.mxu1 %v520_v62  ;;  %v535_v50 = vsel %vm503_vm0, %v433_v36, 0  ;;  %v2341_v51 = vld [vmem:[#allocation3 + $0x16c] sm:$0xf]  ;;  %v2087_v52 = vld [vmem:[#allocation3 + $0x1b8] sm:$0xf0]  ;;  %v2086_v54 = vor.u32 %v2351_v48, %v2085_v45  ;;  %v2082_v59 = vor.u32 %v2340_v43, %v2079_v44  ;;  %v434_v0 = vpack.c.b16 %v358_v49, %v358_v49 }
  0x1f   :  { %649 = vmatpush.bf16.msrb.mxu2 %v523_v63  ;;  %610 = vmatpush.bf16.msra.mxu3 %v1910_v17  ;;  %v1925_v55 = vld [vmem:[#allocation3 + $0x20] sm:$0xf]  ;;  %v2312_v56 = vld [vmem:[#allocation3 + $0x6c] sm:$0xf0]  ;;  %v111_v57 = vld [vmem:[#allocation3 + $0x218] sm:$0x11]  ;;  %v2090_v60 = vor.u32 %v2341_v51, %v2087_v52  ;;  %v435_v18 = vpack.c.b16 %v359_v5, %v359_v5 }
  0x20   :  { %2125 = vmatmul.msk.bf16.vlgmr.msra.gmra.mxu2 %vm499_vm1, %v2622_v58  ;;  %v2321_v61 = vld [vmem:[#allocation3 + $0xc4] sm:$0xf]  ;;  %v2009_v62 = vld [vmem:[#allocation3 + $0xc8] sm:$0xf]  ;;  %v2332_v63 = vld [vmem:[#allocation3 + $0x114] sm:$0xf0]  ;;  %v360_v6 = vunpack.c.l.b16 %v111_v57 }
  0x21   :  { %v2003_v1 = vld [vmem:[#allocation3 + $0x110] sm:$0xf0]  ;;  %v2322_v2 = vld [vmem:[#allocation3 + $0xcc] sm:$0xf]  ;;  %v2011_v3 = vld [vmem:[#allocation3 + $0x118] sm:$0xf0]  ;;  %v2010_v7 = vor.u32 %v2332_v63, %v2009_v62 }
  0x22   :  { %622 = vmatpush.bf16.msrb.mxu0 %v2066_v4  ;;  %636 = vmatpush.bf16.msrb.mxu1 %v2070_v8  ;;  %v1926_v4 = vor.u32 %v2312_v56, %v1925_v55  ;;  %v2302_v8 = vld [vmem:[#allocation3 + $0x24] sm:$0xf]  ;;  %v2006_v10 = vor.u32 %v2321_v61, %v2003_v1  ;;  %v2014_v11 = vor.u32 %v2322_v2, %v2011_v3  ;;  %v1933_v12 = vld [vmem:[#allocation3 + $0x28] sm:$0xf]  ;;  %v2313_v13 = vld [vmem:[#allocation3 + $0x74] sm:$0xf0] }
  0x23   :  { %650 = vmatpush.bf16.msrb.mxu2 %v2074_v9  ;;  %663 = vmatpush.bf16.msrb.mxu3 %v526_v27  ;;  %v361_v9 = vunpack.c.h.b16 %v111_v57  ;;  %v538_v14 = vsel %vm503_vm0, %v434_v0, 0  ;;  %v1927_v15 = vld [vmem:[#allocation3 + $0x70] sm:$0xf0]  ;;  %v2303_v16 = vld [vmem:[#allocation3 + $0x2c] sm:$0xf]  ;;  %v436_v19 = vpack.c.b16 %v360_v6, %v360_v6  ;;  %v541_v28 = vsel %vm503_vm0, %v435_v18, 0 }
  0x24   :  { %2126 = vmatmul.msk.bf16.vlgmr.msra.gmra.mxu3 %vm499_vm1, %v2622_v58  ;;  %v1935_v17 = vld [vmem:[#allocation3 + $0x78] sm:$0xf0]  ;;  %v2093_v22 = vld [vmem:[#allocation3 + $0x170] sm:$0xf]  ;;  %v2352_v23 = vld [vmem:[#allocation3 + $0x1bc] sm:$0xf0]  ;;  %v1930_v24 = vor.u32 %v2302_v8, %v1927_v15 }
  0x25   :  { %v437_v21 = vpack.c.b16 %v361_v9, %v361_v9  ;;  %v2095_v27 = vld [vmem:[#allocation3 + $0x1c0] sm:$0xf0]  ;;  %v544_v29 = vsel %vm503_vm0, %v436_v19, 0  ;;  %v2094_v30 = vor.u32 %v2352_v23, %v2093_v22  ;;  %v2101_v31 = vld [vmem:[#allocation3 + $0x178] sm:$0xf] }
  0x26   :  { %623 = vmatpush.bf16.msrb.mxu0 %v1990_v20  ;;  %637 = vmatpush.bf16.msrb.mxu1 %v1994_v25  ;;  %v1934_v20 = vor.u32 %v2313_v13, %v1933_v12  ;;  %v1938_v25 = vor.u32 %v2303_v16, %v1935_v17  ;;  %v2353_v32 = vld [vmem:[#allocation3 + $0x1c4] sm:$0xf0]  ;;  %v2343_v34 = vld [vmem:[#allocation3 + $0x17c] sm:$0xf]  ;;  %v2323_v41 = vld [vmem:[#allocation3 + $0xd4] sm:$0xf] }
  0x27   :  { %651 = vmatpush.bf16.msrb.mxu2 %v1998_v26  ;;  %664 = vmatpush.bf16.msrb.mxu3 %v2078_v37  ;;  %v2342_v26 = vld [vmem:[#allocation3 + $0x174] sm:$0xf]  ;;  %v547_v33 = vsel %vm503_vm0, %v437_v21, 0  ;;  %v2102_v37 = vor.u32 %v2353_v32, %v2101_v31  ;;  %v2019_v43 = vld [vmem:[#allocation3 + $0x120] sm:$0xf0] }
  0x28   :  { %v2098_v36 = vor.u32 %v2342_v26, %v2095_v27  ;;  %v2025_v44 = vld [vmem:[#allocation3 + $0xd8] sm:$0xf]  ;;  %v2334_v45 = vld [vmem:[#allocation3 + $0x124] sm:$0xf0]  ;;  %v2324_v48 = vld [vmem:[#allocation3 + $0xdc] sm:$0xf] }
  0x29   :  { %v2027_v49 = vld [vmem:[#allocation3 + $0x128] sm:$0xf0]  ;;  %v1941_v51 = vld [vmem:[#allocation3 + $0x30] sm:$0xf]  ;;  %v2314_v52 = vld [vmem:[#allocation3 + $0x7c] sm:$0xf0] }
  0x2a   :  { %624 = vmatpush.bf16.msrb.mxu0 %v1914_v35  ;;  %638 = vmatpush.bf16.msrb.mxu1 %v1918_v39  ;;  %v2103_v35 = vld [vmem:[#allocation3 + $0x1c8] sm:$0xf0]  ;;  %v2017_v39 = vld [vmem:[#allocation3 + $0xd0] sm:$0xf]  ;;  %v1943_v55 = vld [vmem:[#allocation3 + $0x80] sm:$0xf0] }
  0x2b   :  { %652 = vmatpush.bf16.msrb.mxu2 %v1922_v40  ;;  %665 = vmatpush.bf16.msrb.mxu3 %v2002_v53  ;;  %v2106_v38 = vor.u32 %v2343_v34, %v2103_v35  ;;  %v2333_v40 = vld [vmem:[#allocation3 + $0x11c] sm:$0xf0]  ;;  %v2304_v53 = vld [vmem:[#allocation3 + $0x34] sm:$0xf]  ;;  %v1949_v56 = vld [vmem:[#allocation3 + $0x38] sm:$0xf] }
  0x2c   :  { %v2018_v42 = vor.u32 %v2333_v40, %v2017_v39  ;;  %v2315_v57 = vld [vmem:[#allocation3 + $0x84] sm:$0xf0]  ;;  %v2305_v61 = vld [vmem:[#allocation3 + $0x3c] sm:$0xf]  ;;  %v1951_v62 = vld [vmem:[#allocation3 + $0x88] sm:$0xf0] }
  0x2d   :  { %2127 = vmatmul.msk.bf16.vlgmr.msrb.gmra.mxu0 %vm499_vm1, %v2622_v58  ;;  %2128 = vmatmul.msk.bf16.vlgmr.msrb.gmra.mxu1 %vm499_vm1, %v2622_v58  ;;  %v112_v63 = vld [vmem:[#allocation3 + $0x220] sm:$0x11]  ;;  %v1954_v0 = vor.u32 %v2305_v61, %v1951_v62  ;;  %v113_v3 = vld [vmem:[#allocation3 + $0x228] sm:$0x11]  ;;  %v2354_v13 = vld [vmem:[#allocation3 + $0x1cc] sm:$0xf0] }
  0x2e   :  { %677 = vmatpush.bf16.msra.mxu0 %v529_v46  ;;  %691 = vmatpush.bf16.msra.mxu1 %v532_v47  ;;  %v2022_v46 = vor.u32 %v2323_v41, %v2019_v43  ;;  %v2026_v47 = vor.u32 %v2334_v45, %v2025_v44  ;;  %v362_v1 = vunpack.c.l.b16 %v112_v63  ;;  %v363_v2 = vunpack.c.h.b16 %v112_v63  ;;  %v2109_v12 = vld [vmem:[#allocation3 + $0x180] sm:$0xf]  ;;  %v2344_v17 = vld [vmem:[#allocation3 + $0x184] sm:$0xf]  ;;  %v2111_v18 = vld [vmem:[#allocation3 + $0x1d0] sm:$0xf0] }
  0x2f   :  { %705 = vmatpush.bf16.msra.mxu2 %v535_v50  ;;  %666 = vmatpush.bf16.msrb.mxu3 %v1926_v4  ;;  %v2030_v50 = vor.u32 %v2324_v48, %v2027_v49  ;;  %v364_v4 = vunpack.c.l.b16 %v113_v3  ;;  %v365_v5 = vunpack.c.h.b16 %v113_v3  ;;  %v2110_v16 = vor.u32 %v2354_v13, %v2109_v12  ;;  %v2355_v21 = vld [vmem:[#allocation3 + $0x1d4] sm:$0xf0]  ;;  %v2345_v22 = vld [vmem:[#allocation3 + $0x18c] sm:$0xf]  ;;  %v2033_v26 = vld [vmem:[#allocation3 + $0xe0] sm:$0xf] }
  0x30   :  { %2129 = vmatmul.msk.bf16.vlgmr.msrb.gmra.mxu2 %vm499_vm1, %v2622_v58  ;;  %v438_v6 = vpack.c.b16 %v362_v1, %v362_v1  ;;  %v2114_v19 = vor.u32 %v2344_v17, %v2111_v18  ;;  %v2335_v27 = vld [vmem:[#allocation3 + $0x12c] sm:$0xf0]  ;;  %v2041_v31 = vld [vmem:[#allocation3 + $0xe8] sm:$0xf]  ;;  %v2336_v32 = vld [vmem:[#allocation3 + $0x134] sm:$0xf0] }
  0x31   :  { %v440_v8 = vpack.c.b16 %v364_v4, %v364_v4  ;;  %v441_v9 = vpack.c.b16 %v365_v5, %v365_v5  ;;  %v2042_v34 = vor.u32 %v2336_v32, %v2041_v31  ;;  %v2326_v35 = vld [vmem:[#allocation3 + $0xec] sm:$0xf]  ;;  %v2316_v39 = vld [vmem:[#allocation3 + $0x8c] sm:$0xf0]  ;;  %v2306_v40 = vld [vmem:[#allocation3 + $0x44] sm:$0xf] }
  0x32   :  { %692 = vmatpush.bf16.msra.mxu1 %v2086_v54  ;;  %678 = vmatpush.bf16.msra.mxu0 %v2082_v59  ;;  %v1942_v54 = vor.u32 %v2314_v52, %v1941_v51  ;;  %v1946_v59 = vor.u32 %v2304_v53, %v1943_v55  ;;  %v1965_v43 = vld [vmem:[#allocation3 + $0x48] sm:$0xf]  ;;  %v2317_v44 = vld [vmem:[#allocation3 + $0x94] sm:$0xf0]  ;;  %v1967_v48 = vld [vmem:[#allocation3 + $0x98] sm:$0xf0] }
  0x33   :  { %706 = vmatpush.bf16.msra.mxu2 %v2090_v60  ;;  %719 = vmatpush.bf16.msra.mxu3 %v538_v14  ;;  %v1950_v60 = vor.u32 %v2315_v57, %v1949_v56  ;;  %v556_v14 = vsel %vm503_vm0, %v440_v8, 0  ;;  %v559_v15 = vsel %vm503_vm0, %v441_v9, 0  ;;  %v2260_v49 = vld [vmem:[%s3521_s2 + $0xe0] sm:$0xf]  ;;  %v2386_v52 = vld [vmem:[%s3521_s2 + $0xec] sm:$0xf0] }
  0x34   :  { %2130 = vmatmul.msk.bf16.vlgmr.msrb.gmra.mxu3 %vm499_vm1, %v2622_v58  ;;  %v2384_v53 = vld [vmem:[%s3521_s2 + $0xe4] sm:$0xf]  ;;  %v2262_v55 = vld [vmem:[%s3521_s2 + $0xf0] sm:$0xf0]  ;;  %v2268_v56 = vld [vmem:[%s3521_s2 + $0xe8] sm:$0xf] }
  0x35   :  { %v2387_v57 = vld [vmem:[%s3521_s2 + $0xf4] sm:$0xf0]  ;;  %v2385_v61 = vld [vmem:[%s3521_s2 + $0xec] sm:$0xf]  ;;  %v2270_v62 = vld [vmem:[%s3521_s2 + $0xf8] sm:$0xf0] }
  0x36   :  { %693 = vmatpush.bf16.msra.mxu1 %v2010_v7  ;;  %679 = vmatpush.bf16.msra.mxu0 %v2006_v10  ;;  %v439_v7 = vpack.c.b16 %v363_v2, %v363_v2  ;;  %v550_v10 = vsel %vm503_vm0, %v438_v6, 0  ;;  %v2244_v63 = vld [vmem:[%s3521_s2 + $0xc0] sm:$0xf]  ;;  %v2382_v1 = vld [vmem:[%s3521_s2 + $0xcc] sm:$0xf0] }
  0x37   :  { %707 = vmatpush.bf16.msra.mxu2 %v2014_v11  ;;  %720 = vmatpush.bf16.msra.mxu3 %v2094_v30  ;;  %v2035_v30 = vld [vmem:[#allocation3 + $0x130] sm:$0xf0]  ;;  %v2380_v2 = vld [vmem:[%s3521_s2 + $0xc4] sm:$0xf]  ;;  %v2720_v4 = vor.u32 %v2382_v1, %v2244_v63  ;;  %v2252_v6 = vld [vmem:[%s3521_s2 + $0xc8] sm:$0xf] }
  0x38   :  { %v553_v11 = vsel %vm503_vm0, %v439_v7, 0  ;;  %v2246_v3 = vld [vmem:[%s3521_s2 + $0xd0] sm:$0xf0]  ;;  %v2383_v7 = vld [vmem:[%s3521_s2 + $0xd4] sm:$0xf0] }
  0x39   :  { %v2722_v5 = vor.u32 %v2380_v2, %v2246_v3  ;;  %v2381_v8 = vld [vmem:[%s3521_s2 + $0xcc] sm:$0xf]  ;;  %v2254_v12 = vld [vmem:[%s3521_s2 + $0xd8] sm:$0xf0]  ;;  %v2230_v17 = vld [vmem:[%s3521_s2 + $0xb0] sm:$0xf0] }
  0x3a   :  { %694 = vmatpush.bf16.msra.mxu1 %v1934_v20  ;;  %680 = vmatpush.bf16.msra.mxu0 %v1930_v24  ;;  %v2117_v20 = vld [vmem:[#allocation3 + $0x188] sm:$0xf]  ;;  %v2119_v24 = vld [vmem:[#allocation3 + $0x1d8] sm:$0xf0]  ;;  %v2742_v13 = vor.u32 %v2381_v8, %v2254_v12  ;;  %v2374_v31 = vld [vmem:[%s3521_s2 + $0x8c] sm:$0xf0] }
  0x3b   :  { %708 = vmatpush.bf16.msra.mxu2 %v1938_v25  ;;  %721 = vmatpush.bf16.msra.mxu3 %v2018_v42  ;;  %v2118_v23 = vor.u32 %v2355_v21, %v2117_v20  ;;  %v2122_v25 = vor.u32 %v2345_v22, %v2119_v24  ;;  %v1959_v42 = vld [vmem:[#allocation3 + $0x90] sm:$0xf0]  ;;  %v2236_v18 = vld [vmem:[%s3521_s2 + $0xa8] sm:$0xf]  ;;  %v2377_v22 = vld [vmem:[%s3521_s2 + $0xac] sm:$0xf] }
  0x3c   :  { %v1962_v45 = vor.u32 %v2306_v40, %v1959_v42  ;;  %v2372_v32 = vld [vmem:[%s3521_s2 + $0x84] sm:$0xf]  ;;  %v2180_v1 = vld [vmem:[%s3521_s2 + $0x40] sm:$0xf]  ;;  %v2366_v2 = vld [vmem:[%s3521_s2 + $0x4c] sm:$0xf0] }
  0x3d   :  { %2131 = vmatmul.msk.bf16.vlgmr.msra.gmra.mxu0 %vm499_vm1, %v2622_v58  ;;  %2132 = vmatmul.msk.bf16.vlgmr.msra.gmra.mxu1 %vm499_vm1, %v2622_v58  ;;  %v2364_v3 = vld [vmem:[%s3521_s2 + $0x44] sm:$0xf]  ;;  %v2367_v8 = vld [vmem:[%s3521_s2 + $0x54] sm:$0xf0] }
  0x3e   :  { %733 = vmatpush.bf16.msrb.mxu0 %v541_v28  ;;  %747 = vmatpush.bf16.msrb.mxu1 %v544_v29  ;;  %v2325_v28 = vld [vmem:[#allocation3 + $0xe4] sm:$0xf]  ;;  %v2034_v29 = vor.u32 %v2335_v27, %v2033_v26 }
  0x3f   :  { %761 = vmatpush.bf16.msrb.mxu2 %v547_v33  ;;  %722 = vmatpush.bf16.msra.mxu3 %v1942_v54  ;;  %v2038_v33 = vor.u32 %v2325_v28, %v2035_v30  ;;  %v2683_v54 = vor.u32 %v2386_v52, %v2260_v49  ;;  %v2212_v30 = vld [vmem:[%s3521_s2 + $0x80] sm:$0xf]  ;;  %v2369_v52 = vld [vmem:[%s3521_s2 + $0x6c] sm:$0xf] }
  0x40   :  { %2133 = vmatmul.msk.bf16.vlgmr.msra.gmra.mxu2 %vm499_vm1, %v2622_v58 }
  0x42   :  { %734 = vmatpush.bf16.msrb.mxu0 %v2098_v36  ;;  %748 = vmatpush.bf16.msrb.mxu1 %v2102_v37  ;;  %v2043_v36 = vld [vmem:[#allocation3 + $0x138] sm:$0xf0] }
  0x43   :  { %762 = vmatpush.bf16.msrb.mxu2 %v2106_v38  ;;  %775 = vmatpush.bf16.msrb.mxu3 %v550_v10  ;;  %v2046_v37 = vor.u32 %v2326_v35, %v2043_v36  ;;  %v1957_v38 = vld [vmem:[#allocation3 + $0x40] sm:$0xf]  ;;  %v2375_v35 = vld [vmem:[%s3521_s2 + $0x94] sm:$0xf0] }
  0x44   :  { %2134 = vmatmul.msk.bf16.vlgmr.msra.gmra.mxu3 %vm499_vm1, %v2622_v58  ;;  %v1958_v41 = vor.u32 %v2316_v39, %v1957_v38  ;;  %v2812_v38 = vor.u32 %v2374_v31, %v2212_v30  ;;  %v2373_v39 = vld [vmem:[%s3521_s2 + $0x8c] sm:$0xf]  ;;  %v2166_v31 = vld [vmem:[%s3521_s2 + $0x30] sm:$0xf0] }
  0x46   :  { %735 = vmatpush.bf16.msrb.mxu0 %v2022_v46  ;;  %749 = vmatpush.bf16.msrb.mxu1 %v2026_v47  ;;  %v1966_v46 = vor.u32 %v2317_v44, %v1965_v43  ;;  %v2307_v47 = vld [vmem:[#allocation3 + $0x4c] sm:$0xf]  ;;  %v2196_v43 = vld [vmem:[%s3521_s2 + $0x60] sm:$0xf] }
  0x47   :  { %763 = vmatpush.bf16.msrb.mxu2 %v2030_v50  ;;  %776 = vmatpush.bf16.msrb.mxu3 %v2110_v16  ;;  %v2675_v50 = vld [vmem:[%s3522_s3] sm:$0xff]  ;;  %v1970_v51 = vor.u32 %v2307_v47, %v1967_v48  ;;  %v2370_v44 = vld [vmem:[%s3521_s2 + $0x6c] sm:$0xf0]  ;;  %v2204_v47 = vld [vmem:[%s3521_s2 + $0x68] sm:$0xf] }
  0x48   :  { %v120_v9 = vperm.slane %v2675_v50, 0  ;;  %v121_v10 = vperm.slane %v2675_v50, 2  ;;  %v2376_v16 = vld [vmem:[%s3521_s2 + $0xa4] sm:$0xf]  ;;  %v2371_v48 = vld [vmem:[%s3521_s2 + $0x74] sm:$0xf0]  ;;  %v2848_v49 = vor.u32 %v2370_v44, %v2196_v43 }
  0x49   :  { %v2772_v21 = vor.u32 %v2376_v16, %v2230_v17  ;;  %v2365_v16 = vld [vmem:[%s3521_s2 + $0x4c] sm:$0xf] }
  0x4a   :  { %736 = vmatpush.bf16.msrb.mxu0 %v1946_v59  ;;  %750 = vmatpush.bf16.msrb.mxu1 %v1950_v60  ;;  %v2694_v59 = vor.u32 %v2384_v53, %v2262_v55  ;;  %v2696_v60 = vor.u32 %v2387_v57, %v2268_v56  ;;  %v2206_v53 = vld [vmem:[%s3521_s2 + $0x78] sm:$0xf0]  ;;  %v2860_v57 = vor.u32 %v2371_v48, %v2204_v47  ;;  %v2150_v47 = vld [vmem:[%s3521_s2 + $0x10] sm:$0xf0]  ;;  %v2156_v48 = vld [vmem:[%s3521_s2 + $0x8] sm:$0xf] }
  0x4b   :  { %764 = vmatpush.bf16.msrb.mxu2 %v1954_v0  ;;  %777 = vmatpush.bf16.msrb.mxu3 %v2034_v29  ;;  %v2707_v0 = vor.u32 %v2385_v61, %v2270_v62  ;;  %v2862_v61 = vor.u32 %v2369_v52, %v2206_v53  ;;  %v2359_v52 = vld [vmem:[%s3521_s2 + $0x14] sm:$0xf0]  ;;  %v2357_v53 = vld [vmem:[%s3521_s2 + $0xc] sm:$0xf] }
  0x4d   :  { %2135 = vmatmul.msk.bf16.vlgmr.msrb.gmra.mxu0 %vm499_vm1, %v2622_v58  ;;  %2136 = vmatmul.msk.bf16.vlgmr.msrb.gmra.mxu1 %vm499_vm1, %v2622_v58 }
  0x4e   :  { %789 = vmatpush.bf16.msra.mxu0 %v553_v11  ;;  %803 = vmatpush.bf16.msra.mxu1 %v556_v14  ;;  %v2737_v11 = vor.u32 %v2383_v7, %v2252_v6  ;;  %v2228_v14 = vld [vmem:[%s3521_s2 + $0xa0] sm:$0xf]  ;;  %v2182_v6 = vld [vmem:[%s3521_s2 + $0x50] sm:$0xf0]  ;;  %v2188_v7 = vld [vmem:[%s3521_s2 + $0x48] sm:$0xf] }
  0x4f   :  { %817 = vmatpush.bf16.msra.mxu2 %v559_v15  ;;  %778 = vmatpush.bf16.msrb.mxu3 %v1958_v41  ;;  %v2378_v15 = vld [vmem:[%s3521_s2 + $0xac] sm:$0xf0]  ;;  %v2222_v41 = vld [vmem:[%s3521_s2 + $0x98] sm:$0xf0] }
  0x50   :  { %2137 = vmatmul.msk.bf16.vlgmr.msrb.gmra.mxu2 %vm499_vm1, %v2622_v58  ;;  %v2770_v20 = vor.u32 %v2378_v15, %v2228_v14  ;;  %v2826_v42 = vor.u32 %v2373_v39, %v2222_v41  ;;  %v2888_v14 = vor.u32 %v2366_v2, %v2180_v1  ;;  %v2890_v15 = vor.u32 %v2364_v3, %v2182_v6  ;;  %v2174_v39 = vld [vmem:[%s3521_s2 + $0x38] sm:$0xf0]  ;;  %v2148_v41 = vld [vmem:[%s3521_s2] sm:$0xf] }
  0x51   :  { %v2981_v3 = vor.u32 %v2359_v52, %v2156_v48 }
  0x52   :  { %790 = vmatpush.bf16.msra.mxu0 %v2114_v19  ;;  %804 = vmatpush.bf16.msra.mxu1 %v2118_v23  ;;  %v2379_v19 = vld [vmem:[%s3521_s2 + $0xb4] sm:$0xf0]  ;;  %v2238_v23 = vld [vmem:[%s3521_s2 + $0xb8] sm:$0xf0] }
  0x53   :  { %818 = vmatpush.bf16.msra.mxu2 %v2122_v25  ;;  %1104 = vmatpush.bf16.msra.mxu3 %v2683_v54  ;;  %v2782_v26 = vor.u32 %v2379_v19, %v2236_v18  ;;  %v2784_v27 = vor.u32 %v2377_v22, %v2238_v23  ;;  %v2899_v19 = vor.u32 %v2367_v8, %v2188_v7  ;;  %v2190_v22 = vld [vmem:[%s3521_s2 + $0x58] sm:$0xf0]  ;;  %v2164_v23 = vld [vmem:[%s3521_s2 + $0x20] sm:$0xf] }
  0x54   :  { %2138 = vmatmul.msk.bf16.vlgmr.msrb.gmra.mxu3 %vm499_vm1, %v2622_v58 }
  0x56   :  { %791 = vmatpush.bf16.msra.mxu0 %v2038_v33  ;;  %805 = vmatpush.bf16.msra.mxu1 %v2042_v34  ;;  %v2214_v33 = vld [vmem:[%s3521_s2 + $0x90] sm:$0xf0]  ;;  %v2220_v34 = vld [vmem:[%s3521_s2 + $0x88] sm:$0xf] }
  0x57   :  { %819 = vmatpush.bf16.msra.mxu2 %v2046_v37  ;;  %1105 = vmatpush.bf16.msra.mxu3 %v2720_v4  ;;  %v2821_v40 = vor.u32 %v2375_v35, %v2220_v34  ;;  %v2172_v34 = vld [vmem:[%s3521_s2 + $0x28] sm:$0xf]  ;;  %v2363_v35 = vld [vmem:[%s3521_s2 + $0x34] sm:$0xf0] }
  0x58   :  { %v2945_v43 = vor.u32 %v2363_v35, %v2172_v34 }
  0x5a   :  { %792 = vmatpush.bf16.msra.mxu0 %v1962_v45  ;;  %806 = vmatpush.bf16.msra.mxu1 %v1966_v46  ;;  %v2368_v45 = vld [vmem:[%s3521_s2 + $0x64] sm:$0xf]  ;;  %v2198_v46 = vld [vmem:[%s3521_s2 + $0x70] sm:$0xf0] }
  0x5b   :  { %820 = vmatpush.bf16.msra.mxu2 %v1970_v51  ;;  %1106 = vmatpush.bf16.msra.mxu3 %v2770_v20  ;;  %v2850_v51 = vor.u32 %v2368_v45, %v2198_v46  ;;  %v2358_v45 = vld [vmem:[%s3521_s2 + $0xc] sm:$0xf0]  ;;  %v2356_v46 = vld [vmem:[%s3521_s2 + $0x4] sm:$0xf] }
  0x5d   :  { %2139 = vmatmul.msk.bf16.vlgmr.msra.gmra.mxu0 %vm499_vm1, %v2622_v58  ;;  %2140 = vmatmul.msk.bf16.vlgmr.msra.gmra.mxu1 %vm499_vm1, %v2622_v58 }
  0x5e   :  { %1118 = vmatpush.bf16.msrb.mxu0 %v2694_v59  ;;  %1132 = vmatpush.bf16.msrb.mxu1 %v2696_v60 }
  0x5f   :  { %1146 = vmatpush.bf16.msrb.mxu2 %v2707_v0  ;;  %1107 = vmatpush.bf16.msra.mxu3 %v2812_v38 }
  0x60   :  { %2141 = vmatmul.msk.bf16.vlgmr.msra.gmra.mxu2 %vm499_vm1, %v2622_v58  ;;  %v2814_v58 = vor.u32 %v2372_v32, %v2214_v33 }
  0x62   :  { %1119 = vmatpush.bf16.msrb.mxu0 %v2722_v5  ;;  %1133 = vmatpush.bf16.msrb.mxu1 %v2737_v11 }
  0x63   :  { %1147 = vmatpush.bf16.msrb.mxu2 %v2742_v13  ;;  %1108 = vmatpush.bf16.msra.mxu3 %v2848_v49 }
  0x66   :  { %1120 = vmatpush.bf16.msrb.mxu0 %v2772_v21  ;;  %1134 = vmatpush.bf16.msrb.mxu1 %v2782_v26 }
  0x67   :  { %1148 = vmatpush.bf16.msrb.mxu2 %v2784_v27  ;;  %1109 = vmatpush.bf16.msra.mxu3 %v2888_v14 }
  0x6a   :  { %1121 = vmatpush.bf16.msrb.mxu0 %v2814_v58  ;;  %1135 = vmatpush.bf16.msrb.mxu1 %v2821_v40 }
  0x6b   :  { %1149 = vmatpush.bf16.msrb.mxu2 %v2826_v42 }
  0x6e   :  { %1122 = vmatpush.bf16.msrb.mxu0 %v2850_v51  ;;  %1136 = vmatpush.bf16.msrb.mxu1 %v2860_v57 }
  0x6f   :  { %1150 = vmatpush.bf16.msrb.mxu2 %v2862_v61 }
  0x72   :  { %1123 = vmatpush.bf16.msrb.mxu0 %v2890_v15  ;;  %1137 = vmatpush.bf16.msrb.mxu1 %v2899_v19 }
  0x76   :  { %1138 = vmatpush.bf16.msrb.mxu1 %v2945_v43 }
  0x7a   :  { %1139 = vmatpush.bf16.msrb.mxu1 %v2981_v3 }
  0x7e   :  { %1323 = vmatpush.bf16.msra.mxu1 %v2696_v60 }
  0x82   :  { %1324 = vmatpush.bf16.msra.mxu1 %v2737_v11 }
  0x86   :  { %1325 = vmatpush.bf16.msra.mxu1 %v2782_v26 }
  0x8a   :  { %1326 = vmatpush.bf16.msra.mxu1 %v2821_v40 }
  0x8e   :  { %1327 = vmatpush.bf16.msra.mxu1 %v2860_v57 }
  0x92   :  { %1328 = vmatpush.bf16.msra.mxu1 %v2899_v19 }
  0x96   :  { %1329 = vmatpush.bf16.msra.mxu1 %v2945_v43 }
  0x9a   :  { %v570_v24 = vpop.f32.mrf.mxu0  ;;  %v584_v25 = vpop.f32.mrf.mxu1  ;;  %1330 = vmatpush.bf16.msra.mxu1 %v2981_v3 }
  0x9b   :  { %v571_v28 = vadd.f32 %v570_v24, %v120_v9  ;;  %v585_v29 = vadd.f32 %v584_v25, %v121_v10  ;;  %v2907_v24 = vor.u32 %v2365_v16, %v2190_v22  ;;  %v2362_v25 = vld [vmem:[%s3521_s2 + $0x2c] sm:$0xf0] }
  0x9c   :  { %v2923_v32 = vor.u32 %v2362_v25, %v2164_v23 }
  0x9d   :  { %v2142_v36 = vmul.f32 -1.442695, %v571_v28  ;;  %v2143_v37 = vmul.f32 -1.442695, %v585_v29  ;;  %v2360_v28 = vld [vmem:[%s3521_s2 + $0x24] sm:$0xf]  ;;  %1151 = vmatpush.bf16.msrb.mxu2 %v2907_v24 }
  0x9e   :  { %v2925_v33 = vor.u32 %v2360_v28, %v2166_v31  ;;  %1110 = vmatpush.bf16.msra.mxu3 %v2923_v32 }
  0x9f   :  { %2393 = vpow2.f32 %v2142_v36  ;;  %v2361_v36 = vld [vmem:[%s3521_s2 + $0x2c] sm:$0xf] }
  0xa0   :  { %2395 = vpow2.f32 %v2143_v37  ;;  %v122_v37 = vperm.slane %v2675_v50, 3  ;;  %v2947_v44 = vor.u32 %v2361_v36, %v2174_v39  ;;  %1124 = vmatpush.bf16.msrb.mxu0 %v2925_v33 }
  0xa2   :  { %v572_v55 = vpop.f32.mrf.mxu0  ;;  %v586_v56 = vpop.f32.mrf.mxu1  ;;  %1152 = vmatpush.bf16.msrb.mxu2 %v2947_v44 }
  0xa3   :  { %v573_v62 = vadd.f32 %v572_v55, %v120_v9  ;;  %v587_v63 = vadd.f32 %v586_v56, %v121_v10  ;;  %v598_v30 = vpop.f32.mrf.mxu2  ;;  %v2970_v56 = vor.u32 %v2358_v45, %v2148_v41 }
  0xa5   :  { %v2394_v9 = vpop.eup %2393  ;;  %v2144_v10 = vmul.f32 -1.442695, %v573_v62  ;;  %v2145_v12 = vmul.f32 -1.442695, %v587_v63  ;;  %v2972_v62 = vor.u32 %v2356_v46, %v2150_v47  ;;  %v2158_v63 = vld [vmem:[%s3521_s2 + $0x18] sm:$0xf0]  ;;  %1111 = vmatpush.bf16.msra.mxu3 %v2970_v56 }
  0xa6   :  { %v2396_v17 = vpop.eup %2395  ;;  %v2895_v18 = vadd.f32 1.0, %v2394_v9  ;;  %v2983_v6 = vor.u32 %v2357_v53, %v2158_v63  ;;  %v599_v9 = vadd.f32 %v598_v30, %v122_v37 }
  0xa7   :  { %2397 = vpow2.f32 %v2144_v10  ;;  %v2916_v29 = vadd.f32 1.0, %v2396_v17  ;;  %1125 = vmatpush.bf16.msrb.mxu0 %v2972_v62 }
  0xa8   :  { %2399 = vrcp.f32 %v2895_v18  ;;  %3529 = vst [vmem:[#allocation6_spill] sm:$0xff] %v2983_v6  ;;  %1153 = vmatpush.bf16.msrb.mxu2 %v2983_v6  ;;  %v854_v23 = vand.u32 2147483648, %v2895_v18  ;;  %vm848_vm3 = vweird.f32 %v2895_v18  ;;  %v852_v28 = vand.u32 2147483647, %v2895_v18 }
  0xa9   :  { %2401 = vpow2.f32 %v2145_v12  ;;  %1295 = vmatpush.bf16.msrb.mxu3 %v2683_v54  ;;  %vm863_vm10 = vweird.f32 %v2916_v29  ;;  %v867_v35 = vand.u32 2147483647, %v2916_v29 }
  0xaa   :  { %2403 = vrcp.f32 %v2916_v29  ;;  %v855_v41 = vor.u32 1.1754944e-38, %v854_v23  ;;  %vm853_vm5 = vcmp.eq.f32.partialorder %v852_v28, 8.507059e+37 }
  0xab   :  { %v600_v16 = vpop.f32.mrf.mxu2  ;;  %1309 = vmatpush.bf16.msra.mxu0 %v2694_v59  ;;  %vm868_vm0 = vcmp.eq.f32.partialorder %v867_v35, 8.507059e+37 }
  0xac   :  { %1337 = vmatpush.bf16.msra.mxu2 %v2707_v0  ;;  %v601_v30 = vadd.f32 %v600_v16, %v122_v37 }
  0xad   :  { %v2398_v55 = vpop.eup %2397  ;;  %1296 = vmatpush.bf16.msrb.mxu3 %v2720_v4 }
  0xae   :  { %v2400_v1 = vpop.eup %2399  ;;  %v2977_v2 = vadd.f32 1.0, %v2398_v55 }
  0xaf   :  { %v844_v7 = vmul.f32 %v2400_v1, %v2895_v18  ;;  %v2402_v8 = vpop.eup %2401  ;;  %vm849_vm2 = vweird.f32 %v2400_v1  ;;  %1310 = vmatpush.bf16.msra.mxu0 %v2722_v5 }
  0xb0   :  { %2405 = vrcp.f32 %v2977_v2  ;;  %v2987_v12 = vadd.f32 1.0, %v2402_v8  ;;  %v2993_v17 = vpop.eup %2403  ;;  %vm3005_vm4 = vmor %vm848_vm3, %vm849_vm2  ;;  %1338 = vmatpush.bf16.msra.mxu2 %v2742_v13  ;;  %v884_v52 = vand.u32 2147483648, %v2977_v2  ;;  %v882_v55 = vand.u32 2147483647, %v2977_v2 }
  0xb1   :  { %v845_v10 = vsub.f32 1.0, %v844_v7  ;;  %v859_v34 = vmul.f32 %v2993_v17, %v2916_v29  ;;  %1297 = vmatpush.bf16.msrb.mxu3 %v2770_v20  ;;  %vm878_vm7 = vweird.f32 %v2977_v2  ;;  %vm864_vm11 = vweird.f32 %v2993_v17 }
  0xb2   :  { %2407 = vrcp.f32 %v2987_v12  ;;  %vm883_vm9 = vcmp.eq.f32.partialorder %v882_v55, 8.507059e+37  ;;  %vm893_vm13 = vweird.f32 %v2987_v12  ;;  %vm3049_vm14 = vmor %vm863_vm10, %vm864_vm11  ;;  %v3093_v55 = vpop.f32.mrf.mxu3 }
  0xb3   :  { %v846_v22 = vmul.f32 %v2400_v1, %v845_v10  ;;  %2409 = vtanh.f32 %v599_v9  ;;  %v860_v46 = vsub.f32 1.0, %v859_v34  ;;  %1311 = vmatpush.bf16.msra.mxu0 %v2772_v21  ;;  %v885_v10 = vor.u32 1.1754944e-38, %v884_v52  ;;  %v3083_v52 = vpop.f32.mrf.mxu0  ;;  %v3138_v34 = vld [vmem:[%s3522_s3 + $0x8] sm:$0xff] }
  0xb4   :  { %2411 = vtanh.f32 %v601_v30  ;;  %1339 = vmatpush.bf16.msra.mxu2 %v2784_v27  ;;  %v869_v30 = vand.u32 2147483648, %v2916_v29  ;;  %3541 = vst [vmem:[#allocation14_spill] sm:$0xff] %v3138_v34  ;;  %v132_v35 = vperm.slane %v3138_v34, 5 }
  0xb5   :  { %v847_v25 = vadd.f32 %v2400_v1, %v846_v22  ;;  %v861_v8 = vmul.f32 %v2993_v17, %v860_v46  ;;  %1298 = vmatpush.bf16.msrb.mxu3 %v2812_v38 }
  0xb6   :  { %v2406_v31 = vpop.eup %2405 }
  0xb7   :  { %v874_v36 = vmul.f32 %v2406_v31, %v2977_v2  ;;  %v851_v39 = vsel %vm3005_vm4, %v2400_v1, %v847_v25  ;;  %vm879_vm6 = vweird.f32 %v2406_v31  ;;  %1312 = vmatpush.bf16.msra.mxu0 %v2814_v58  ;;  %v862_v25 = vadd.f32 %v2993_v17, %v861_v8 }
  0xb8   :  { %v3015_v18 = vpop.eup %2407  ;;  %v856_v48 = vsel %vm853_vm5, %v855_v41, %v851_v39  ;;  %vm880_vm8 = vmor %vm878_vm7, %vm879_vm6  ;;  %1340 = vmatpush.bf16.msra.mxu2 %v2826_v42 }
  0xb9   :  { %v875_v37 = vsub.f32 1.0, %v874_v36  ;;  %v2410_v45 = vpop.eup %2409  ;;  %v889_v47 = vmul.f32 %v3015_v18, %v2987_v12  ;;  %vm894_vm12 = vweird.f32 %v3015_v18  ;;  %1299 = vmatpush.bf16.msrb.mxu3 %v2848_v49  ;;  %v897_v36 = vand.u32 2147483647, %v2987_v12 }
  0xba   :  { %v3025_v1 = vmul.f32 %v2410_v45, %v856_v48  ;;  %v2412_v16 = vpop.eup %2411  ;;  %vm895_vm15 = vmor %vm893_vm13, %vm894_vm12  ;;  %v866_v39 = vsel %vm3049_vm14, %v2993_v17, %v862_v25  ;;  %v870_v45 = vor.u32 1.1754944e-38, %v869_v30 }
  0xbb   :  { %v876_v53 = vmul.f32 %v2406_v31, %v875_v37  ;;  %v890_v63 = vsub.f32 1.0, %v889_v47  ;;  %1313 = vmatpush.bf16.msra.mxu0 %v2850_v51  ;;  %vm898_vm1 = vcmp.eq.f32.partialorder %v897_v36, 8.507059e+37  ;;  %v133_v36 = vperm.slane %v3138_v34, 6 }
  0xbc   :  { %2413 = vtanh.f32 %v3025_v1  ;;  %1341 = vmatpush.bf16.msra.mxu2 %v2862_v61 }
  0xbd   :  { %v877_v7 = vadd.f32 %v2406_v31, %v876_v53  ;;  %v891_v9 = vmul.f32 %v3015_v18, %v890_v63  ;;  %1300 = vmatpush.bf16.msrb.mxu3 %v2888_v14  ;;  %v3085_v53 = vpop.f32.mrf.mxu1  ;;  %v3099_v63 = vpop.f32.mrf.mxu2 }
  0xbf   :  { %v881_v22 = vsel %vm880_vm8, %v2406_v31, %v877_v7  ;;  %v892_v28 = vadd.f32 %v3015_v18, %v891_v9  ;;  %v899_v31 = vand.u32 2147483648, %v2987_v12  ;;  %1314 = vmatpush.bf16.msra.mxu0 %v2890_v15  ;;  %v871_v12 = vsel %vm868_vm0, %v870_v45, %v866_v39  ;;  %v3101_v7 = vpop.f32.mrf.mxu0  ;;  %v3109_v9 = vpop.f32.mrf.mxu3 }
  0xc0   :  { %v886_v23 = vsel %vm883_vm9, %v885_v10, %v881_v22  ;;  %1342 = vmatpush.bf16.msra.mxu2 %v2907_v24 }
  0xc1   :  { %v3036_v2 = vmul.f32 %v2412_v16, %v886_v23  ;;  %v896_v41 = vsel %vm895_vm15, %v3015_v18, %v892_v28  ;;  %v900_v46 = vor.u32 1.1754944e-38, %v899_v31  ;;  %1301 = vmatpush.bf16.msrb.mxu3 %v2923_v32 }
  0xc2   :  { %v2414_v37 = vpop.eup %2413 }
  0xc3   :  { %2415 = vtanh.f32 %v3036_v2  ;;  %v901_v47 = vsel %vm898_vm1, %v900_v46, %v896_v41  ;;  %v909_v48 = vmul.f32 %v2414_v37, %v871_v12  ;;  %1315 = vmatpush.bf16.msra.mxu0 %v2925_v33 }
  0xc4   :  { %1343 = vmatpush.bf16.msra.mxu2 %v2947_v44 }
  0xc5   :  { %1302 = vmatpush.bf16.msrb.mxu3 %v2970_v56  ;;  %v3103_v8 = vpop.f32.mrf.mxu1  ;;  %v3115_v10 = vpop.f32.mrf.mxu2 }
  0xc7   :  { %1316 = vmatpush.bf16.msra.mxu0 %v2972_v62  ;;  %v3119_v16 = vpop.f32.mrf.mxu0  ;;  %v3125_v23 = vpop.f32.mrf.mxu3 }
  0xc8   :  { %1344 = vmatpush.bf16.msra.mxu2 %v2983_v6  ;;  %3534 = vst [vmem:[#allocation7_spill] sm:$0xff] %v3119_v16 }
  0xc9   :  { %v2416_v29 = vpop.eup %2415  ;;  %3536 = vst [vmem:[#allocation9_spill] sm:$0xff] %v3125_v23 }
  0xca   :  { %v910_v17 = vmul.f32 %v2416_v29, %v901_v47  ;;  %v131_v29 = vperm.slane %v3138_v34, 4 }
  0xcc   :  { %v911_v18 = vpack.c.bf16 %v910_v17, %v909_v48  ;;  %v134_v48 = vperm.slane %v3138_v34, 7 }
  0xcd   :  { %v3121_v22 = vpop.f32.mrf.mxu1  ;;  %v3127_v25 = vpop.f32.mrf.mxu2 }
  0xce   :  { %1112 = vmatmul.bf16.vlgmr.msra.gmra.mxu3 %v911_v18  ;;  %1126 = vmatmul.bf16.vlgmr.msrb.gmra.mxu0 %v911_v18  ;;  %3535 = vst [vmem:[#allocation8_spill] sm:$0xff] %v3121_v22 }
  0xcf   :  { %1140 = vmatmul.bf16.vlgmr.msrb.gmra.mxu1 %v911_v18  ;;  %1154 = vmatmul.bf16.vlgmr.msrb.gmra.mxu2 %v911_v18  ;;  %3537 = vst [vmem:[#allocation10_spill] sm:$0xff] %v3127_v25  ;;  %v3129_v28 = vpop.f32.mrf.mxu0  ;;  %v3133_v31 = vpop.f32.mrf.mxu3 }
  0xd0   :  { %1486 = vmatpush.bf16.msra.mxu3 %v2683_v54  ;;  %1500 = vmatpush.bf16.msrb.mxu0 %v2694_v59  ;;  %3538 = vst [vmem:[#allocation11_spill] sm:$0xff] %v3129_v28 }
  0xd1   :  { %1514 = vmatpush.bf16.msrb.mxu1 %v2696_v60  ;;  %1528 = vmatpush.bf16.msrb.mxu2 %v2707_v0  ;;  %3540 = vst [vmem:[#allocation13_spill] sm:$0xff] %v3133_v31 }
  0xd4   :  { %1487 = vmatpush.bf16.msra.mxu3 %v2720_v4  ;;  %1501 = vmatpush.bf16.msrb.mxu0 %v2722_v5 }
  0xd5   :  { %1515 = vmatpush.bf16.msrb.mxu1 %v2737_v11  ;;  %1529 = vmatpush.bf16.msrb.mxu2 %v2742_v13  ;;  %v3131_v30 = vpop.f32.mrf.mxu1  ;;  %v3142_v39 = vpop.f32.mrf.mxu2 }
  0xd6   :  { %3539 = vst [vmem:[#allocation12_spill] sm:$0xff] %v3131_v30 }
  0xd7   :  { %3542 = vst [vmem:[#allocation15_spill] sm:$0xff] %v3142_v39  ;;  %v738_v41 = vpop.f32.mrf.mxu0  ;;  %v724_v12 = vpop.f32.mrf.mxu3 }
  0xd8   :  { %1488 = vmatpush.bf16.msra.mxu3 %v2770_v20  ;;  %1502 = vmatpush.bf16.msrb.mxu0 %v2772_v21  ;;  %v3144_v45 = vadd.f32 %v738_v41, %v132_v35  ;;  %v3149_v47 = vadd.f32 %v724_v12, %v131_v29 }
  0xd9   :  { %1516 = vmatpush.bf16.msrb.mxu1 %v2782_v26  ;;  %1530 = vmatpush.bf16.msrb.mxu2 %v2784_v27 }
  0xda   :  { %3543 = vst [vmem:[#allocation16_spill] sm:$0xff] %v3144_v45 }
  0xdb   :  { %3545 = vst [vmem:[#allocation18_spill] sm:$0xff] %v3149_v47 }
  0xdc   :  { %1489 = vmatpush.bf16.msra.mxu3 %v2812_v38  ;;  %1503 = vmatpush.bf16.msrb.mxu0 %v2814_v58 }
  0xdd   :  { %1517 = vmatpush.bf16.msrb.mxu1 %v2821_v40  ;;  %1531 = vmatpush.bf16.msrb.mxu2 %v2826_v42  ;;  %v752_v37 = vpop.f32.mrf.mxu1  ;;  %v766_v31 = vpop.f32.mrf.mxu2 }
  0xde   :  { %v3146_v46 = vadd.f32 %v752_v37, %v133_v36  ;;  %v3156_v39 = vadd.f32 %v766_v31, %v134_v48  ;;  %v125_v31 = vperm.slane %v2675_v50, 6 }
  0xdf   :  { %v740_v17 = vpop.f32.mrf.mxu0  ;;  %v726_v41 = vpop.f32.mrf.mxu3 }
  0xe0   :  { %1490 = vmatpush.bf16.msra.mxu3 %v2848_v49  ;;  %1504 = vmatpush.bf16.msrb.mxu0 %v2850_v51  ;;  %3544 = vst [vmem:[#allocation17_spill] sm:$0xff] %v3146_v46  ;;  %v3152_v25 = vadd.f32 %v740_v17, %v132_v35  ;;  %v3158_v45 = vadd.f32 %v726_v41, %v131_v29 }
  0xe1   :  { %1518 = vmatpush.bf16.msrb.mxu1 %v2860_v57  ;;  %1532 = vmatpush.bf16.msrb.mxu2 %v2862_v61  ;;  %3548 = vst [vmem:[#allocation21_spill] sm:$0xff] %v3156_v39 }
  0xe2   :  { %3546 = vst [vmem:[#allocation19_spill] sm:$0xff] %v3152_v25 }
  0xe3   :  { %3549 = vst [vmem:[#allocation22_spill] sm:$0xff] %v3158_v45 }
  0xe4   :  { %1491 = vmatpush.bf16.msra.mxu3 %v2888_v14  ;;  %1505 = vmatpush.bf16.msrb.mxu0 %v2890_v15 }
  0xe5   :  { %1519 = vmatpush.bf16.msrb.mxu1 %v2899_v19  ;;  %1533 = vmatpush.bf16.msrb.mxu2 %v2907_v24  ;;  %v754_v18 = vpop.f32.mrf.mxu1  ;;  %v768_v37 = vpop.f32.mrf.mxu2 }
  0xe6   :  { %v3154_v30 = vadd.f32 %v754_v18, %v133_v36  ;;  %v3160_v46 = vadd.f32 %v768_v37, %v134_v48  ;;  %v124_v36 = vperm.slane %v2675_v50, 5  ;;  %v641_v48 = vadd.f32 %v3085_v53, %v125_v31 }
  0xe7   :  { %v3164_v12 = vpop.f32.mrf.mxu0  ;;  %v3166_v47 = vpop.f32.mrf.mxu3  ;;  %v123_v37 = vperm.slane %v2675_v50, 4 }
  0xe8   :  { %1492 = vmatpush.bf16.msra.mxu3 %v2923_v32  ;;  %1506 = vmatpush.bf16.msrb.mxu0 %v2925_v33  ;;  %3547 = vst [vmem:[#allocation20_spill] sm:$0xff] %v3154_v30  ;;  %v627_v29 = vadd.f32 %v3083_v52, %v124_v36  ;;  %v643_v52 = vadd.f32 %v3103_v8, %v125_v31 }
  0xe9   :  { %1520 = vmatpush.bf16.msrb.mxu1 %v2945_v43  ;;  %1534 = vmatpush.bf16.msrb.mxu2 %v2947_v44  ;;  %3550 = vst [vmem:[#allocation23_spill] sm:$0xff] %v3160_v46 }
  0xea   :  { %3552 = vst [vmem:[#allocation25_spill] sm:$0xff] %v3164_v12 }
  0xeb   :  { %3553 = vst [vmem:[#allocation26_spill] sm:$0xff] %v3166_v47 }
  0xec   :  { %1493 = vmatpush.bf16.msra.mxu3 %v2970_v56  ;;  %1507 = vmatpush.bf16.msrb.mxu0 %v2972_v62 }
  0xed   :  { %1521 = vmatpush.bf16.msrb.mxu1 %v2981_v3  ;;  %1535 = vmatpush.bf16.msrb.mxu2 %v2983_v6  ;;  %v3162_v28 = vpop.f32.mrf.mxu1  ;;  %v3178_v18 = vpop.f32.mrf.mxu2 }
  0xee   :  { %3551 = vst [vmem:[#allocation24_spill] sm:$0xff] %v3162_v28 }
  0xef   :  { %v3170_v35 = vpop.f32.mrf.mxu0  ;;  %v3174_v17 = vpop.f32.mrf.mxu3  ;;  %3557 = vst [vmem:[#allocation30_spill] sm:$0xff] %v3178_v18 }
  0xf0   :  { %3555 = vst [vmem:[#allocation28_spill] sm:$0xff] %v3170_v35  ;;  %v613_v35 = vadd.f32 %v3093_v55, %v123_v37 }
  0xf1   :  { %3556 = vst [vmem:[#allocation29_spill] sm:$0xff] %v3174_v17  ;;  %v629_v17 = vadd.f32 %v3101_v7, %v124_v36 }
  0xf5   :  { %v3168_v23 = vpop.f32.mrf.mxu1  ;;  %v3184_v22 = vpop.f32.mrf.mxu2 }
  0xf6   :  { %3554 = vst [vmem:[#allocation27_spill] sm:$0xff] %v3168_v23 }
  0xf7   :  { %3558 = vst [vmem:[#allocation31_spill] sm:$0xff] %v3184_v22 }
 0x14b   :  { %v1127_v41 = vpop.f32.mrf.mxu0 }
 0x14c   :  { %v1161_v47 = vadd.f32 %v1127_v41, %v627_v29  ;;  %v1141_v28 = vpop.f32.mrf.mxu1 }
 0x14d   :  { %v1162_v23 = vadd.f32 %v1141_v28, %v641_v48 }
 0x14e   :  { %v2275_v12 = vmul.f32 -1.442695, %v1161_v47 }
 0x14f   :  { %v2276_v46 = vmul.f32 -1.442695, %v1162_v23  ;;  %v615_v23 = vadd.f32 %v3109_v9, %v123_v37 }
 0x150   :  { %2417 = vpow2.f32 %v2275_v12 }
 0x151   :  { %v1113_v39 = vpop.f32.mrf.mxu3  ;;  %2419 = vpow2.f32 %v2276_v46 }
 0x152   :  { %v1160_v45 = vadd.f32 %v1113_v39, %v613_v35 }
 0x153   :  { %v1129_v53 = vpop.f32.mrf.mxu0 }
 0x154   :  { %v2274_v30 = vmul.f32 -1.442695, %v1160_v45  ;;  %v1165_v18 = vadd.f32 %v1129_v53, %v629_v17  ;;  %v1143_v25 = vpop.f32.mrf.mxu1  ;;  %v1155_v17 = vpop.f32.mrf.mxu2 }
 0x155   :  { %v1166_v29 = vadd.f32 %v1143_v25, %v643_v52  ;;  %v126_v25 = vperm.slane %v2675_v50, 7 }
 0x156   :  { %v2418_v28 = vpop.eup %2417  ;;  %2421 = vpow2.f32 %v2274_v30  ;;  %v2278_v47 = vmul.f32 -1.442695, %v1165_v18 }
 0x157   :  { %v1187_v55 = vadd.f32 1.0, %v2418_v28  ;;  %v2279_v12 = vmul.f32 -1.442695, %v1166_v29  ;;  %v2420_v8 = vpop.eup %2419  ;;  %v655_v37 = vadd.f32 %v3099_v63, %v126_v25 }
 0x158   :  { %2423 = vpow2.f32 %v2278_v47  ;;  %v3188_v30 = vadd.f32 1.0, %v2420_v8 }
 0x159   :  { %2425 = vrcp.f32 %v1187_v55  ;;  %v1115_v7 = vpop.f32.mrf.mxu3  ;;  %v1163_v28 = vadd.f32 %v1155_v17, %v655_v37  ;;  %vm1212_vm3 = vweird.f32 %v1187_v55 }
 0x15a   :  { %v1164_v39 = vadd.f32 %v1115_v7, %v615_v23  ;;  %2427 = vpow2.f32 %v2279_v12  ;;  %v1218_v7 = vand.u32 2147483648, %v1187_v55 }
 0x15c   :  { %v2422_v45 = vpop.eup %2421  ;;  %v2277_v35 = vmul.f32 -1.442695, %v1164_v39  ;;  %v1216_v39 = vand.u32 2147483647, %v1187_v55 }
 0x15d   :  { %v1186_v36 = vadd.f32 1.0, %v2422_v45 }
 0x15e   :  { %v2424_v31 = vpop.eup %2423  ;;  %2429 = vpow2.f32 %v2277_v35  ;;  %vm1217_vm6 = vcmp.eq.f32.partialorder %v1216_v39, 8.507059e+37 }
 0x15f   :  { %v2426_v46 = vpop.eup %2425  ;;  %2431 = vrcp.f32 %v1186_v36  ;;  %v3190_v9 = vadd.f32 1.0, %v2424_v31  ;;  %v1201_v31 = vand.u32 2147483647, %v1186_v36  ;;  %v1203_v17 = vand.u32 2147483648, %v1186_v36 }
 0x160   :  { %v1208_v48 = vmul.f32 %v2426_v46, %v1187_v55  ;;  %v2428_v18 = vpop.eup %2427  ;;  %vm1213_vm2 = vweird.f32 %v2426_v46  ;;  %vm1197_vm7 = vweird.f32 %v1186_v36 }
 0x161   :  { %2433 = vrcp.f32 %v3190_v9  ;;  %v3195_v52 = vadd.f32 1.0, %v2428_v18  ;;  %vm3203_vm4 = vmor %vm1212_vm3, %vm1213_vm2  ;;  %v1157_v18 = vpop.f32.mrf.mxu2  ;;  %vm1202_vm9 = vcmp.eq.f32.partialorder %v1201_v31, 8.507059e+37  ;;  %vm1257_vm10 = vweird.f32 %v3190_v9 }
 0x162   :  { %v1209_v41 = vsub.f32 1.0, %v1208_v48  ;;  %2435 = vrcp.f32 %v3188_v30  ;;  %v1263_v39 = vand.u32 2147483648, %v3190_v9 }
 0x163   :  { %2437 = vrcp.f32 %v3195_v52 }
 0x164   :  { %v2430_v53 = vpop.eup %2429  ;;  %v1210_v29 = vmul.f32 %v2426_v46, %v1209_v41  ;;  %v657_v41 = vadd.f32 %v3115_v10, %v126_v25  ;;  %v1204_v10 = vor.u32 1.1754944e-38, %v1203_v17 }
 0x165   :  { %v2432_v50 = vpop.eup %2431  ;;  %v3197_v47 = vadd.f32 1.0, %v2430_v53  ;;  %v1219_v53 = vor.u32 1.1754944e-38, %v1218_v7 }
 0x166   :  { %v1193_v12 = vmul.f32 %v2432_v50, %v1186_v36  ;;  %v1211_v23 = vadd.f32 %v2426_v46, %v1210_v29  ;;  %vm1198_vm5 = vweird.f32 %v2432_v50 }
 0x167   :  { %2439 = vrcp.f32 %v3197_v47  ;;  %v2434_v63 = vpop.eup %2433  ;;  %vm1199_vm8 = vmor %vm1197_vm7, %vm1198_vm5  ;;  %vm1242_vm14 = vweird.f32 %v3197_v47  ;;  %vm1272_vm5 = vweird.f32 %v3195_v52 }
 0x168   :  { %v1194_v8 = vsub.f32 1.0, %v1193_v12  ;;  %v3201_v45 = vpop.eup %2435  ;;  %2441 = vtanh.f32 %v1163_v28  ;;  %v1253_v48 = vmul.f32 %v2434_v63, %v3190_v9  ;;  %v1215_v55 = vsel %vm3203_vm4, %v2426_v46, %v1211_v23 }
 0x169   :  { %v3211_v12 = vpop.eup %2437  ;;  %v1223_v22 = vmul.f32 %v3201_v45, %v3188_v30  ;;  %v1167_v28 = vadd.f32 %v1157_v18, %v657_v41  ;;  %v1220_v25 = vsel %vm1217_vm6, %v1219_v53, %v1215_v55  ;;  %vm1258_vm11 = vweird.f32 %v2434_v63 }
 0x16a   :  { %v1195_v37 = vmul.f32 %v2432_v50, %v1194_v8  ;;  %v1254_v29 = vsub.f32 1.0, %v1253_v48  ;;  %v1268_v36 = vmul.f32 %v3211_v12, %v3195_v52  ;;  %v1284_v48 = vmul.f32 %v1220_v25, %v3025_v1  ;;  %vm3222_vm12 = vmor %vm1257_vm10, %vm1258_vm11 }
 0x16b   :  { %v1261_v18 = vand.u32 2147483647, %v3190_v9  ;;  %2443 = vtanh.f32 %v1167_v28  ;;  %v1224_v55 = vsub.f32 1.0, %v1223_v22  ;;  %v1264_v53 = vor.u32 1.1754944e-38, %v1263_v39 }
 0x16c   :  { %v1196_v16 = vadd.f32 %v2432_v50, %v1195_v37  ;;  %v1255_v8 = vmul.f32 %v2434_v63, %v1254_v29  ;;  %v1269_v29 = vsub.f32 1.0, %v1268_v36  ;;  %vm1228_vm2 = vweird.f32 %v3201_v45 }
 0x16d   :  { %v2440_v34 = vpop.eup %2439  ;;  %vm1262_vm15 = vcmp.eq.f32.partialorder %v1261_v18, 8.507059e+37  ;;  %vm1273_vm3 = vweird.f32 %v3211_v12  ;;  %vm1227_vm4 = vweird.f32 %v3188_v30  ;;  %v1233_v36 = vand.u32 2147483648, %v3188_v30 }
 0x16e   :  { %v1200_v6 = vsel %vm1199_vm8, %v2432_v50, %v1196_v16  ;;  %v1238_v46 = vmul.f32 %v2440_v34, %v3197_v47  ;;  %v2442_v23 = vpop.eup %2441  ;;  %v1256_v35 = vadd.f32 %v2434_v63, %v1255_v8  ;;  %v1246_v50 = vand.u32 2147483647, %v3197_v47  ;;  %vm1229_vm6 = vmor %vm1227_vm4, %vm1228_vm2 }
 0x16f   :  { %v1205_v7 = vsel %vm1202_vm9, %v1204_v10, %v1200_v6  ;;  %v1248_v6 = vand.u32 2147483648, %v3197_v47  ;;  %vm1243_vm13 = vweird.f32 %v2440_v34  ;;  %vm1274_vm7 = vmor %vm1272_vm5, %vm1273_vm3  ;;  %v1234_v16 = vor.u32 1.1754944e-38, %v1233_v36 }
 0x170   :  { %v1286_v31 = vmul.f32 %v2442_v23, %v1205_v7  ;;  %v1239_v17 = vsub.f32 1.0, %v1238_v46  ;;  %v1260_v1 = vsel %vm3222_vm12, %v2434_v63, %v1256_v35  ;;  %vm1244_vm0 = vmor %vm1242_vm14, %vm1243_vm13  ;;  %vm1247_vm1 = vcmp.eq.f32.partialorder %v1246_v50, 8.507059e+37 }
 0x171   :  { %v1249_v10 = vor.u32 1.1754944e-38, %v1248_v6  ;;  %v1265_v25 = vsel %vm1262_vm15, %v1264_v53, %v1260_v1  ;;  %v2444_v28 = vpop.eup %2443  ;;  %v1225_v46 = vmul.f32 %v3201_v45, %v1224_v55  ;;  %v1270_v23 = vmul.f32 %v3211_v12, %v1269_v29 }
 0x172   :  { %v3228_v41 = vadd.f32 %v1286_v31, %v1284_v48  ;;  %v1240_v37 = vmul.f32 %v2440_v34, %v1239_v17  ;;  %v1285_v63 = vmul.f32 %v1265_v25, %v3036_v2  ;;  %v1278_v2 = vand.u32 2147483648, %v3195_v52 }
 0x173   :  { %v1226_v47 = vadd.f32 %v3201_v45, %v1225_v46  ;;  %v1231_v35 = vand.u32 2147483647, %v3188_v30  ;;  %v1276_v48 = vand.u32 2147483647, %v3195_v52  ;;  %v3570_v52 = vld [vmem:[#allocation13_spill] sm:$0xff] }
 0x174   :  { %v1241_v9 = vadd.f32 %v2440_v34, %v1240_v37  ;;  %2445 = vtanh.f32 %v3228_v41  ;;  %v1279_v50 = vor.u32 1.1754944e-38, %v1278_v2 }
 0x175   :  { %v1230_v31 = vsel %vm1229_vm6, %v3201_v45, %v1226_v47  ;;  %vm1232_vm8 = vcmp.eq.f32.partialorder %v1231_v35, 8.507059e+37  ;;  %vm1277_vm9 = vcmp.eq.f32.partialorder %v1276_v48, 8.507059e+37  ;;  %v3571_v35 = vld [vmem:[#allocation10_spill] sm:$0xff] }
 0x176   :  { %v1245_v8 = vsel %vm1244_vm0, %v2440_v34, %v1241_v9  ;;  %v1271_v34 = vadd.f32 %v3211_v12, %v1270_v23  ;;  %v1235_v37 = vsel %vm1232_vm8, %v1234_v16, %v1230_v31 }
 0x177   :  { %v1250_v7 = vsel %vm1247_vm1, %v1249_v10, %v1245_v8 }
 0x178   :  { %v1287_v22 = vmul.f32 %v2444_v28, %v1250_v7  ;;  %v1275_v17 = vsel %vm1274_vm7, %v3211_v12, %v1271_v34 }
 0x179   :  { %v1280_v1 = vsel %vm1277_vm9, %v1279_v50, %v1275_v17 }
 0x17a   :  { %v3237_v39 = vadd.f32 %v1287_v22, %v1285_v63  ;;  %v2446_v18 = vpop.eup %2445 }
 0x17b   :  { %v1292_v55 = vmul.f32 %v2446_v18, %v1235_v37 }
 0x17c   :  { %2447 = vtanh.f32 %v3237_v39 }
 0x182   :  { %v2448_v6 = vpop.eup %2447 }
 0x183   :  { %v1293_v53 = vmul.f32 %v2448_v6, %v1280_v1 }
 0x185   :  { %v1294_v29 = vpack.c.bf16 %v1293_v53, %v1292_v55 }
 0x187   :  { %1303 = vmatmul.bf16.vlgmr.msrb.gmra.mxu3 %v1294_v29  ;;  %1317 = vmatmul.bf16.vlgmr.msra.gmra.mxu0 %v1294_v29 }
 0x188   :  { %1331 = vmatmul.bf16.vlgmr.msra.gmra.mxu1 %v1294_v29  ;;  %1345 = vmatmul.bf16.vlgmr.msra.gmra.mxu2 %v1294_v29 }
 0x189   :  { %1677 = vmatpush.bf16.msrb.mxu3 %v2683_v54  ;;  %1691 = vmatpush.bf16.msra.mxu0 %v2694_v59  ;;  %v3563_v54 = vld [vmem:[#allocation6_spill] sm:$0xff] }
 0x18a   :  { %1705 = vmatpush.bf16.msra.mxu1 %v2696_v60  ;;  %1719 = vmatpush.bf16.msra.mxu2 %v2707_v0  ;;  %v3564_v59 = vld [vmem:[#allocation14_spill] sm:$0xff] }
 0x18b   :  { %v128_v60 = vperm.slane %v3564_v59, 1  ;;  %v129_v0 = vperm.slane %v3564_v59, 2  ;;  %v130_v7 = vperm.slane %v3564_v59, 3 }
 0x18d   :  { %1678 = vmatpush.bf16.msrb.mxu3 %v2720_v4  ;;  %1692 = vmatpush.bf16.msra.mxu0 %v2722_v5  ;;  %v3565_v4 = vld [vmem:[#allocation7_spill] sm:$0xff]  ;;  %v711_v48 = vadd.f32 %v3571_v35, %v130_v7 }
 0x18e   :  { %1706 = vmatpush.bf16.msra.mxu1 %v2737_v11  ;;  %1720 = vmatpush.bf16.msra.mxu2 %v2742_v13  ;;  %v683_v5 = vadd.f32 %v3565_v4, %v128_v60  ;;  %v3566_v11 = vld [vmem:[#allocation8_spill] sm:$0xff] }
 0x18f   :  { %v697_v13 = vadd.f32 %v3566_v11, %v129_v0 }
 0x191   :  { %1679 = vmatpush.bf16.msrb.mxu3 %v2770_v20  ;;  %1693 = vmatpush.bf16.msra.mxu0 %v2772_v21  ;;  %v127_v21 = vperm.slane %v3564_v59, 0 }
 0x192   :  { %1707 = vmatpush.bf16.msra.mxu1 %v2782_v26  ;;  %1721 = vmatpush.bf16.msra.mxu2 %v2784_v27 }
 0x193   :  { %v671_v45 = vadd.f32 %v3570_v52, %v127_v21 }
 0x195   :  { %1680 = vmatpush.bf16.msrb.mxu3 %v2812_v38  ;;  %1694 = vmatpush.bf16.msra.mxu0 %v2814_v58 }
 0x196   :  { %1708 = vmatpush.bf16.msra.mxu1 %v2821_v40  ;;  %1722 = vmatpush.bf16.msra.mxu2 %v2826_v42  ;;  %v3567_v40 = vld [vmem:[#allocation9_spill] sm:$0xff] }
 0x197   :  { %v669_v42 = vadd.f32 %v3567_v40, %v127_v21 }
 0x199   :  { %1681 = vmatpush.bf16.msrb.mxu3 %v2848_v49  ;;  %1695 = vmatpush.bf16.msra.mxu0 %v2850_v51 }
 0x19a   :  { %1709 = vmatpush.bf16.msra.mxu1 %v2860_v57  ;;  %1723 = vmatpush.bf16.msra.mxu2 %v2862_v61  ;;  %v3568_v57 = vld [vmem:[#allocation11_spill] sm:$0xff] }
 0x19b   :  { %v685_v61 = vadd.f32 %v3568_v57, %v128_v60 }
 0x19d   :  { %1682 = vmatpush.bf16.msrb.mxu3 %v2888_v14  ;;  %1696 = vmatpush.bf16.msra.mxu0 %v2890_v15  ;;  %v3569_v15 = vld [vmem:[#allocation12_spill] sm:$0xff] }
 0x19e   :  { %1710 = vmatpush.bf16.msra.mxu1 %v2899_v19  ;;  %1724 = vmatpush.bf16.msra.mxu2 %v2907_v24  ;;  %v699_v19 = vadd.f32 %v3569_v15, %v129_v0 }
 0x1a1   :  { %1683 = vmatpush.bf16.msrb.mxu3 %v2923_v32  ;;  %1697 = vmatpush.bf16.msra.mxu0 %v2925_v33 }
 0x1a2   :  { %1711 = vmatpush.bf16.msra.mxu1 %v2945_v43  ;;  %1725 = vmatpush.bf16.msra.mxu2 %v2947_v44 }
 0x1a5   :  { %1684 = vmatpush.bf16.msrb.mxu3 %v2970_v56  ;;  %1698 = vmatpush.bf16.msra.mxu0 %v2972_v62 }
 0x1a6   :  { %1712 = vmatpush.bf16.msra.mxu1 %v2981_v3  ;;  %1726 = vmatpush.bf16.msra.mxu2 %v3563_v54 }
 0x204   :  { %v1318_v20 = vpop.f32.mrf.mxu0 }
 0x205   :  { %v1352_v26 = vadd.f32 %v1318_v20, %v683_v5  ;;  %v1332_v27 = vpop.f32.mrf.mxu1 }
 0x206   :  { %v1353_v38 = vadd.f32 %v1332_v27, %v697_v13  ;;  %v3574_v13 = vld [vmem:[#allocation15_spill] sm:$0xff] }
 0x207   :  { %v2281_v58 = vmul.f32 -1.442695, %v1352_v26  ;;  %v713_v20 = vadd.f32 %v3574_v13, %v130_v7 }
 0x208   :  { %v2282_v49 = vmul.f32 -1.442695, %v1353_v38 }
 0x209   :  { %2449 = vpow2.f32 %v2281_v58 }
 0x20a   :  { %v1304_v51 = vpop.f32.mrf.mxu3  ;;  %2451 = vpow2.f32 %v2282_v49 }
 0x20b   :  { %v1351_v14 = vadd.f32 %v1304_v51, %v669_v42  ;;  %v1346_v22 = vpop.f32.mrf.mxu2 }
 0x20c   :  { %v1320_v24 = vpop.f32.mrf.mxu0  ;;  %v1354_v50 = vadd.f32 %v1346_v22, %v711_v48 }
 0x20d   :  { %v2280_v32 = vmul.f32 -1.442695, %v1351_v14  ;;  %v1356_v33 = vadd.f32 %v1320_v24, %v685_v61  ;;  %v1334_v43 = vpop.f32.mrf.mxu1 }
 0x20e   :  { %v1357_v44 = vadd.f32 %v1334_v43, %v699_v19 }
 0x20f   :  { %v2450_v56 = vpop.eup %2449  ;;  %2453 = vpow2.f32 %v2280_v32  ;;  %v2284_v62 = vmul.f32 -1.442695, %v1356_v33 }
 0x210   :  { %v1378_v3 = vadd.f32 1.0, %v2450_v56  ;;  %v2285_v30 = vmul.f32 -1.442695, %v1357_v44  ;;  %v2452_v10 = vpop.eup %2451 }
 0x211   :  { %2455 = vpow2.f32 %v2284_v62  ;;  %v3294_v63 = vadd.f32 1.0, %v2452_v10 }
 0x212   :  { %2457 = vrcp.f32 %v1378_v3  ;;  %v1306_v12 = vpop.f32.mrf.mxu3  ;;  %v1409_v55 = vand.u32 2147483648, %v1378_v3  ;;  %v1407_v53 = vand.u32 2147483647, %v1378_v3  ;;  %vm1403_vm11 = vweird.f32 %v1378_v3 }
 0x213   :  { %v1355_v9 = vadd.f32 %v1306_v12, %v671_v45  ;;  %2459 = vpow2.f32 %v2285_v30  ;;  %v1348_v11 = vpop.f32.mrf.mxu2 }
 0x214   :  { %v1410_v27 = vor.u32 1.1754944e-38, %v1409_v55  ;;  %vm1408_vm14 = vcmp.eq.f32.partialorder %v1407_v53, 8.507059e+37  ;;  %v1358_v49 = vadd.f32 %v1348_v11, %v713_v20 }
 0x215   :  { %v2454_v25 = vpop.eup %2453  ;;  %v2283_v8 = vmul.f32 -1.442695, %v1355_v9 }
 0x216   :  { %v1377_v28 = vadd.f32 1.0, %v2454_v25 }
 0x217   :  { %v2456_v46 = vpop.eup %2455  ;;  %2461 = vpow2.f32 %v2283_v8 }
 0x218   :  { %v2458_v23 = vpop.eup %2457  ;;  %2463 = vrcp.f32 %v1377_v28  ;;  %v3296_v34 = vadd.f32 1.0, %v2456_v46  ;;  %v1392_v0 = vand.u32 2147483647, %v1377_v28  ;;  %v1394_v4 = vand.u32 2147483648, %v1377_v28 }
 0x219   :  { %v1399_v47 = vmul.f32 %v2458_v23, %v1378_v3  ;;  %v2460_v36 = vpop.eup %2459  ;;  %vm1404_vm10 = vweird.f32 %v2458_v23  ;;  %vm1388_vm15 = vweird.f32 %v1377_v28 }
 0x21a   :  { %2465 = vrcp.f32 %v3296_v34  ;;  %v3301_v31 = vadd.f32 1.0, %v2460_v36  ;;  %vm3309_vm12 = vmor %vm1403_vm11, %vm1404_vm10  ;;  %vm1393_vm1 = vcmp.eq.f32.partialorder %v1392_v0, 8.507059e+37  ;;  %v1395_v57 = vor.u32 1.1754944e-38, %v1394_v4 }
 0x21b   :  { %v1400_v2 = vsub.f32 1.0, %v1399_v47  ;;  %2467 = vrcp.f32 %v3294_v63  ;;  %vm1448_vm2 = vweird.f32 %v3296_v34  ;;  %v1454_v33 = vand.u32 2147483648, %v3296_v34 }
 0x21c   :  { %2469 = vrcp.f32 %v3301_v31  ;;  %v1452_v30 = vand.u32 2147483647, %v3296_v34 }
 0x21d   :  { %v2462_v17 = vpop.eup %2461  ;;  %v1401_v18 = vmul.f32 %v2458_v23, %v1400_v2  ;;  %v1455_v8 = vor.u32 1.1754944e-38, %v1454_v33 }
 0x21e   :  { %v2464_v16 = vpop.eup %2463  ;;  %v3303_v6 = vadd.f32 1.0, %v2462_v17  ;;  %vm1453_vm7 = vcmp.eq.f32.partialorder %v1452_v30, 8.507059e+37 }
 0x21f   :  { %v1384_v37 = vmul.f32 %v2464_v16, %v1377_v28  ;;  %v1402_v1 = vadd.f32 %v2458_v23, %v1401_v18  ;;  %vm1389_vm13 = vweird.f32 %v2464_v16 }
 0x220   :  { %2471 = vrcp.f32 %v3303_v6  ;;  %v2466_v29 = vpop.eup %2465  ;;  %vm1390_vm0 = vmor %vm1388_vm15, %vm1389_vm13  ;;  %v1437_v45 = vand.u32 2147483647, %v3303_v6  ;;  %v1439_v12 = vand.u32 2147483648, %v3303_v6  ;;  %vm1433_vm6 = vweird.f32 %v3303_v6 }
 0x221   :  { %v1385_v54 = vsub.f32 1.0, %v1384_v37  ;;  %v3307_v59 = vpop.eup %2467  ;;  %2473 = vtanh.f32 %v1354_v50  ;;  %v1444_v5 = vmul.f32 %v2466_v29, %v3296_v34  ;;  %v1406_v26 = vsel %vm3309_vm12, %v2458_v23, %v1402_v1 }
 0x222   :  { %v3317_v58 = vpop.eup %2469  ;;  %v1414_v40 = vmul.f32 %v3307_v59, %v3294_v63  ;;  %v1411_v61 = vsel %vm1408_vm14, %v1410_v27, %v1406_v26  ;;  %vm1449_vm3 = vweird.f32 %v2466_v29  ;;  %2475 = vtanh.f32 %v1358_v49 }
 0x223   :  { %v1386_v21 = vmul.f32 %v2464_v16, %v1385_v54  ;;  %v1445_v38 = vsub.f32 1.0, %v1444_v5  ;;  %v1459_v43 = vmul.f32 %v3317_v58, %v3301_v31  ;;  %v1475_v56 = vmul.f32 %v1411_v61, %v3228_v41  ;;  %vm3328_vm4 = vmor %vm1448_vm2, %vm1449_vm3 }
 0x224   :  { %v1415_v25 = vsub.f32 1.0, %v1414_v40  ;;  %v1440_v23 = vor.u32 1.1754944e-38, %v1439_v12  ;;  %vm1438_vm9 = vcmp.eq.f32.partialorder %v1437_v45, 8.507059e+37  ;;  %vm1419_vm10 = vweird.f32 %v3307_v59  ;;  %v3579_v40 = vld [vmem:[#allocation18_spill] sm:$0xff] }
 0x225   :  { %v1387_v42 = vadd.f32 %v2464_v16, %v1386_v21  ;;  %v1446_v14 = vmul.f32 %v2466_v29, %v1445_v38  ;;  %v1460_v28 = vsub.f32 1.0, %v1459_v43  ;;  %vm1464_vm11 = vweird.f32 %v3317_v58  ;;  %v3578_v21 = vld [vmem:[#allocation17_spill] sm:$0xff] }
 0x226   :  { %v2472_v51 = vpop.eup %2471  ;;  %v1416_v34 = vmul.f32 %v3307_v59, %v1415_v25  ;;  %vm1418_vm12 = vweird.f32 %v3294_v63  ;;  %v1424_v50 = vand.u32 2147483648, %v3294_v63  ;;  %vm1463_vm13 = vweird.f32 %v3301_v31 }
 0x227   :  { %v1391_v15 = vsel %vm1390_vm0, %v2464_v16, %v1387_v42  ;;  %v1429_v19 = vmul.f32 %v2472_v51, %v3303_v6  ;;  %v2474_v24 = vpop.eup %2473  ;;  %v1447_v44 = vadd.f32 %v2466_v29, %v1446_v14  ;;  %vm1434_vm5 = vweird.f32 %v2472_v51  ;;  %vm1420_vm14 = vmor %vm1418_vm12, %vm1419_vm10 }
 0x228   :  { %v1396_v32 = vsel %vm1393_vm1, %v1395_v57, %v1391_v15  ;;  %vm1435_vm8 = vmor %vm1433_vm6, %vm1434_vm5  ;;  %v2476_v47 = vpop.eup %2475  ;;  %v1461_v36 = vmul.f32 %v3317_v58, %v1460_v28  ;;  %v1417_v18 = vadd.f32 %v3307_v59, %v1416_v34  ;;  %v1422_v6 = vand.u32 2147483647, %v3294_v63  ;;  %v3580_v57 = vld [vmem:[#allocation19_spill] sm:$0xff]  ;;  %v3581_v15 = vld [vmem:[#allocation20_spill] sm:$0xff] }
 0x229   :  { %v1477_v62 = vmul.f32 %v2474_v24, %v1396_v32  ;;  %v1430_v3 = vsub.f32 1.0, %v1429_v19  ;;  %v1451_v41 = vsel %vm3328_vm4, %v2466_v29, %v1447_v44  ;;  %v1467_v37 = vand.u32 2147483647, %v3301_v31  ;;  %vm1465_vm15 = vmor %vm1463_vm13, %vm1464_vm11 }
 0x22a   :  { %v1456_v7 = vsel %vm1453_vm7, %v1455_v8, %v1451_v41  ;;  %v1462_v16 = vadd.f32 %v3317_v58, %v1461_v36  ;;  %v1421_v1 = vsel %vm1420_vm14, %v3307_v59, %v1417_v18  ;;  %v1425_v29 = vor.u32 1.1754944e-38, %v1424_v50  ;;  %v3583_v36 = vld [vmem:[#allocation21_spill] sm:$0xff] }
 0x22b   :  { %v3334_v9 = vadd.f32 %v1477_v62, %v1475_v56  ;;  %v1431_v10 = vmul.f32 %v2472_v51, %v1430_v3  ;;  %v1476_v35 = vmul.f32 %v1456_v7, %v3237_v39  ;;  %v1469_v39 = vand.u32 2147483648, %v3301_v31  ;;  %v3577_v31 = vld [vmem:[#allocation16_spill] sm:$0xff]  ;;  %v3582_v56 = vld [vmem:[#allocation22_spill] sm:$0xff] }
 0x22c   :  { %v1466_v55 = vsel %vm1465_vm15, %v3317_v58, %v1462_v16  ;;  %vm1423_vm0 = vcmp.eq.f32.partialorder %v1422_v6, 8.507059e+37  ;;  %vm1468_vm1 = vcmp.eq.f32.partialorder %v1467_v37, 8.507059e+37 }
 0x22d   :  { %v1432_v46 = vadd.f32 %v2472_v51, %v1431_v10  ;;  %2477 = vtanh.f32 %v3334_v9  ;;  %v1470_v54 = vor.u32 1.1754944e-38, %v1469_v39  ;;  %v1426_v0 = vsel %vm1423_vm0, %v1425_v29, %v1421_v1 }
 0x22f   :  { %v1436_v22 = vsel %vm1435_vm8, %v2472_v51, %v1432_v46  ;;  %v1471_v4 = vsel %vm1468_vm1, %v1470_v54, %v1466_v55 }
 0x230   :  { %v1441_v2 = vsel %vm1438_vm9, %v1440_v23, %v1436_v22 }
 0x231   :  { %v1478_v48 = vmul.f32 %v2476_v47, %v1441_v2 }
 0x233   :  { %v3343_v17 = vadd.f32 %v1478_v48, %v1476_v35  ;;  %v2478_v53 = vpop.eup %2477 }
 0x234   :  { %v1483_v5 = vmul.f32 %v2478_v53, %v1426_v0 }
 0x235   :  { %2479 = vtanh.f32 %v3343_v17 }
 0x23b   :  { %v2480_v60 = vpop.eup %2479 }
 0x23c   :  { %v1484_v11 = vmul.f32 %v2480_v60, %v1471_v4 }
 0x23e   :  { %v1485_v13 = vpack.c.bf16 %v1484_v11, %v1483_v5 }
 0x240   :  { %1494 = vmatmul.bf16.vlgmr.msra.gmra.mxu3 %v1485_v13  ;;  %1508 = vmatmul.bf16.vlgmr.msrb.gmra.mxu0 %v1485_v13 }
 0x241   :  { %1522 = vmatmul.bf16.vlgmr.msrb.gmra.mxu1 %v1485_v13  ;;  %1536 = vmatmul.bf16.vlgmr.msrb.gmra.mxu2 %v1485_v13 }
 0x2bd   :  { %v1509_v63 = vpop.f32.mrf.mxu0 }
 0x2be   :  { %v1543_v59 = vadd.f32 %v1509_v63, %v3577_v31  ;;  %v1523_v20 = vpop.f32.mrf.mxu1  ;;  %v3586_v31 = vld [vmem:[#allocation23_spill] sm:$0xff] }
 0x2bf   :  { %v1544_v26 = vadd.f32 %v1523_v20, %v3578_v21 }
 0x2c0   :  { %v2287_v27 = vmul.f32 -1.442695, %v1543_v59 }
 0x2c1   :  { %v2288_v38 = vmul.f32 -1.442695, %v1544_v26 }
 0x2c2   :  { %2481 = vpow2.f32 %v2287_v27 }
 0x2c3   :  { %v1495_v58 = vpop.f32.mrf.mxu3  ;;  %2483 = vpow2.f32 %v2288_v38 }
 0x2c4   :  { %v1542_v42 = vadd.f32 %v1495_v58, %v3579_v40  ;;  %v1537_v25 = vpop.f32.mrf.mxu2 }
 0x2c5   :  { %v1511_v49 = vpop.f32.mrf.mxu0  ;;  %v1545_v2 = vadd.f32 %v1537_v25, %v3583_v36 }
 0x2c6   :  { %v2286_v51 = vmul.f32 -1.442695, %v1542_v42  ;;  %v1547_v61 = vadd.f32 %v1511_v49, %v3580_v57  ;;  %v1525_v14 = vpop.f32.mrf.mxu1 }
 0x2c7   :  { %v1548_v19 = vadd.f32 %v1525_v14, %v3581_v15 }
 0x2c8   :  { %v2482_v24 = vpop.eup %2481  ;;  %2485 = vpow2.f32 %v2286_v51  ;;  %v2290_v32 = vmul.f32 -1.442695, %v1547_v61 }
 0x2c9   :  { %v1569_v33 = vadd.f32 1.0, %v2482_v24  ;;  %v2291_v43 = vmul.f32 -1.442695, %v1548_v19  ;;  %v2484_v3 = vpop.eup %2483 }
 0x2ca   :  { %2487 = vpow2.f32 %v2290_v32  ;;  %v3364_v41 = vadd.f32 1.0, %v2484_v3 }
 0x2cb   :  { %2489 = vrcp.f32 %v1569_v33  ;;  %v1497_v44 = vpop.f32.mrf.mxu3  ;;  %v1600_v16 = vand.u32 2147483648, %v1569_v33  ;;  %v1598_v50 = vand.u32 2147483647, %v1569_v33  ;;  %vm1594_vm3 = vweird.f32 %v1569_v33 }
 0x2cc   :  { %v1546_v62 = vadd.f32 %v1497_v44, %v3582_v56  ;;  %2491 = vpow2.f32 %v2291_v43  ;;  %v1539_v54 = vpop.f32.mrf.mxu2  ;;  %v1615_v36 = vand.u32 2147483648, %v3364_v41 }
 0x2cd   :  { %v1601_v4 = vor.u32 1.1754944e-38, %v1600_v16  ;;  %vm1599_vm6 = vcmp.eq.f32.partialorder %v1598_v50, 8.507059e+37  ;;  %v1549_v59 = vadd.f32 %v1539_v54, %v3586_v31 }
 0x2ce   :  { %v2486_v30 = vpop.eup %2485  ;;  %v2289_v52 = vmul.f32 -1.442695, %v1546_v62  ;;  %v1616_v50 = vor.u32 1.1754944e-38, %v1615_v36 }
 0x2cf   :  { %v1568_v45 = vadd.f32 1.0, %v2486_v30 }
 0x2d0   :  { %v2488_v12 = vpop.eup %2487  ;;  %2493 = vpow2.f32 %v2289_v52 }
 0x2d1   :  { %v2490_v10 = vpop.eup %2489  ;;  %2495 = vrcp.f32 %v1568_v45  ;;  %v3366_v28 = vadd.f32 1.0, %v2488_v12  ;;  %v1583_v55 = vand.u32 2147483647, %v1568_v45  ;;  %v1585_v53 = vand.u32 2147483648, %v1568_v45 }
 0x2d2   :  { %v1590_v8 = vmul.f32 %v2490_v10, %v1569_v33  ;;  %v2492_v46 = vpop.eup %2491  ;;  %vm1595_vm2 = vweird.f32 %v2490_v10  ;;  %vm1579_vm7 = vweird.f32 %v1568_v45 }
 0x2d3   :  { %2497 = vrcp.f32 %v3366_v28  ;;  %v3370_v7 = vadd.f32 1.0, %v2492_v46  ;;  %vm3379_vm4 = vmor %vm1594_vm3, %vm1595_vm2  ;;  %vm1584_vm9 = vcmp.eq.f32.partialorder %v1583_v55, 8.507059e+37  ;;  %v1586_v21 = vor.u32 1.1754944e-38, %v1585_v53 }
 0x2d4   :  { %v1591_v23 = vsub.f32 1.0, %v1590_v8  ;;  %2499 = vrcp.f32 %v3364_v41  ;;  %vm1639_vm10 = vweird.f32 %v3366_v28  ;;  %v1645_v49 = vand.u32 2147483648, %v3366_v28 }
 0x2d5   :  { %2501 = vrcp.f32 %v3370_v7  ;;  %v1643_v19 = vand.u32 2147483647, %v3366_v28 }
 0x2d6   :  { %v2494_v22 = vpop.eup %2493  ;;  %v1592_v47 = vmul.f32 %v2490_v10, %v1591_v23  ;;  %v1646_v62 = vor.u32 1.1754944e-38, %v1645_v49  ;;  %v3593_v49 = vld [vmem:[#allocation27_spill] sm:$0xff] }
 0x2d7   :  { %v2496_v34 = vpop.eup %2495  ;;  %v3373_v35 = vadd.f32 1.0, %v2494_v22  ;;  %vm1644_vm15 = vcmp.eq.f32.partialorder %v1643_v19, 8.507059e+37 }
 0x2d8   :  { %v1575_v48 = vmul.f32 %v2496_v34, %v1568_v45  ;;  %v1593_v18 = vadd.f32 %v2490_v10, %v1592_v47  ;;  %vm1580_vm5 = vweird.f32 %v2496_v34 }
 0x2d9   :  { %2503 = vrcp.f32 %v3373_v35  ;;  %v2498_v39 = vpop.eup %2497  ;;  %vm1581_vm8 = vmor %vm1579_vm7, %vm1580_vm5  ;;  %v1628_v32 = vand.u32 2147483647, %v3373_v35  ;;  %v1630_v33 = vand.u32 2147483648, %v3373_v35  ;;  %vm1624_vm14 = vweird.f32 %v3373_v35 }
 0x2da   :  { %v1576_v6 = vsub.f32 1.0, %v1575_v48  ;;  %v3377_v37 = vpop.eup %2499  ;;  %2505 = vtanh.f32 %v1545_v2  ;;  %v1635_v29 = vmul.f32 %v2498_v39, %v3366_v28  ;;  %v1597_v0 = vsel %vm3379_vm4, %v2490_v10, %v1593_v18 }
 0x2db   :  { %v3386_v11 = vpop.eup %2501  ;;  %v1605_v13 = vmul.f32 %v3377_v37, %v3364_v41  ;;  %v1602_v26 = vsel %vm1599_vm6, %v1601_v4, %v1597_v0  ;;  %vm1640_vm11 = vweird.f32 %v2498_v39  ;;  %2507 = vtanh.f32 %v1549_v59  ;;  %v3590_v4 = vld [vmem:[#allocation24_spill] sm:$0xff] }
 0x2dc   :  { %v1577_v60 = vmul.f32 %v2496_v34, %v1576_v6  ;;  %v1636_v5 = vsub.f32 1.0, %v1635_v29  ;;  %v1650_v51 = vmul.f32 %v3386_v11, %v3370_v7  ;;  %v1666_v61 = vmul.f32 %v1602_v26, %v3334_v9  ;;  %vm3398_vm12 = vmor %vm1639_vm10, %vm1640_vm11  ;;  %v3591_v26 = vld [vmem:[#allocation26_spill] sm:$0xff] }
 0x2dd   :  { %v1606_v56 = vsub.f32 1.0, %v1605_v13  ;;  %v1631_v52 = vor.u32 1.1754944e-38, %v1630_v33  ;;  %vm1629_vm1 = vcmp.eq.f32.partialorder %v1628_v32, 8.507059e+37  ;;  %vm1610_vm2 = vweird.f32 %v3377_v37 }
 0x2de   :  { %v1578_v63 = vadd.f32 %v2496_v34, %v1577_v60  ;;  %v1637_v27 = vmul.f32 %v2498_v39, %v1636_v5  ;;  %v1651_v3 = vsub.f32 1.0, %v1650_v51  ;;  %vm1655_vm3 = vweird.f32 %v3386_v11  ;;  %v3589_v60 = vld [vmem:[#allocation25_spill] sm:$0xff] }
 0x2df   :  { %v2504_v20 = vpop.eup %2503  ;;  %v1607_v25 = vmul.f32 %v3377_v37, %v1606_v56  ;;  %vm1609_vm4 = vweird.f32 %v3364_v41  ;;  %vm1654_vm5 = vweird.f32 %v3370_v7  ;;  %v1613_v2 = vand.u32 2147483647, %v3364_v41  ;;  %v3431_v41 = vld [vmem:[%s3522_s3 + $0x10] sm:$0xf] }
 0x2e0   :  { %v1582_v38 = vsel %vm1581_vm8, %v2496_v34, %v1578_v63  ;;  %v1620_v58 = vmul.f32 %v2504_v20, %v3373_v35  ;;  %v2506_v40 = vpop.eup %2505  ;;  %v1638_v57 = vadd.f32 %v2498_v39, %v1637_v27  ;;  %vm1625_vm13 = vweird.f32 %v2504_v20  ;;  %vm1611_vm6 = vmor %vm1609_vm4, %vm1610_vm2  ;;  %v3594_v56 = vld [vmem:[#allocation29_spill] sm:$0xff] }
 0x2e1   :  { %v1587_v42 = vsel %vm1584_vm9, %v1586_v21, %v1582_v38  ;;  %vm1626_vm0 = vmor %vm1624_vm14, %vm1625_vm13  ;;  %v2508_v10 = vpop.eup %2507  ;;  %v1652_v8 = vmul.f32 %v3386_v11, %v1651_v3  ;;  %v1608_v47 = vadd.f32 %v3377_v37, %v1607_v25  ;;  %v1658_v35 = vand.u32 2147483647, %v3370_v7 }
 0x2e2   :  { %v1668_v14 = vmul.f32 %v2506_v40, %v1587_v42  ;;  %v1621_v15 = vsub.f32 1.0, %v1620_v58  ;;  %v1642_v9 = vsel %vm3398_vm12, %v2498_v39, %v1638_v57  ;;  %vm1656_vm7 = vmor %vm1654_vm5, %vm1655_vm3  ;;  %vm1614_vm8 = vcmp.eq.f32.partialorder %v1613_v2, 8.507059e+37  ;;  %v3592_v58 = vld [vmem:[#allocation28_spill] sm:$0xff]  ;;  %v3595_v2 = vld [vmem:[#allocation30_spill] sm:$0xff] }
 0x2e3   :  { %v1647_v45 = vsel %vm1644_vm15, %v1646_v62, %v1642_v9  ;;  %v1653_v34 = vadd.f32 %v3386_v11, %v1652_v8  ;;  %v1612_v48 = vsel %vm1611_vm6, %v3377_v37, %v1608_v47  ;;  %vm1659_vm9 = vcmp.eq.f32.partialorder %v1658_v35, 8.507059e+37 }
 0x2e4   :  { %v3404_v43 = vadd.f32 %v1668_v14, %v1666_v61  ;;  %v1622_v44 = vmul.f32 %v2504_v20, %v1621_v15  ;;  %v1667_v46 = vmul.f32 %v1647_v45, %v3343_v17  ;;  %v1660_v17 = vand.u32 2147483648, %v3370_v7 }
 0x2e5   :  { %v1657_v18 = vsel %vm1656_vm7, %v3386_v11, %v1653_v34  ;;  %v1617_v1 = vsel %vm1614_vm8, %v1616_v50, %v1612_v48  ;;  %v136_v7 = vperm.slane %v3431_v41, 1  ;;  %v137_v37 = vperm.slane %v3431_v41, 2 }
 0x2e6   :  { %v1623_v30 = vadd.f32 %v2504_v20, %v1622_v44  ;;  %2509 = vtanh.f32 %v3404_v43  ;;  %v1661_v39 = vor.u32 1.1754944e-38, %v1660_v17  ;;  %v135_v13 = vperm.slane %v3431_v41, 0 }
 0x2e7   :  { %v795_v0 = vadd.f32 %v3589_v60, %v136_v7  ;;  %v809_v5 = vadd.f32 %v3590_v4, %v137_v37  ;;  %v797_v40 = vadd.f32 %v3592_v58, %v136_v7  ;;  %v811_v51 = vadd.f32 %v3593_v49, %v137_v37 }
 0x2e8   :  { %v1627_v12 = vsel %vm1626_vm0, %v2504_v20, %v1623_v30  ;;  %v1662_v55 = vsel %vm1659_vm9, %v1661_v39, %v1657_v18  ;;  %v781_v27 = vadd.f32 %v3591_v26, %v135_v13  ;;  %v783_v62 = vadd.f32 %v3594_v56, %v135_v13 }
 0x2e9   :  { %v1632_v28 = vsel %vm1629_vm1, %v1631_v52, %v1627_v12 }
 0x2ea   :  { %v1669_v23 = vmul.f32 %v2508_v10, %v1632_v28 }
 0x2ec   :  { %v3413_v22 = vadd.f32 %v1669_v23, %v1667_v46  ;;  %v2510_v16 = vpop.eup %2509  ;;  %v138_v46 = vperm.slane %v3431_v41, 3 }
 0x2ed   :  { %v1674_v53 = vmul.f32 %v2510_v16, %v1617_v1 }
 0x2ee   :  { %2511 = vtanh.f32 %v3413_v22  ;;  %v823_v35 = vadd.f32 %v3595_v2, %v138_v46 }
 0x2f4   :  { %v2512_v6 = vpop.eup %2511 }
 0x2f5   :  { %v1675_v29 = vmul.f32 %v2512_v6, %v1662_v55 }
 0x2f7   :  { %v1676_v54 = vpack.c.bf16 %v1675_v29, %v1674_v53 }
 0x2f9   :  { %1685 = vmatmul.bf16.vlgmr.msrb.gmra.mxu3 %v1676_v54  ;;  %1699 = vmatmul.bf16.vlgmr.msra.gmra.mxu0 %v1676_v54 }
 0x2fa   :  { %1713 = vmatmul.bf16.vlgmr.msra.gmra.mxu1 %v1676_v54  ;;  %1727 = vmatmul.bf16.vlgmr.msra.gmra.mxu2 %v1676_v54 }
 0x376   :  { %v1700_v11 = vpop.f32.mrf.mxu0 }
 0x377   :  { %v1734_v63 = vadd.f32 %v1700_v11, %v795_v0  ;;  %v1714_v31 = vpop.f32.mrf.mxu1  ;;  %v3596_v0 = vld [vmem:[#allocation31_spill] sm:$0xff] }
 0x378   :  { %v1735_v59 = vadd.f32 %v1714_v31, %v809_v5  ;;  %v825_v4 = vadd.f32 %v3596_v0, %v138_v46 }
 0x379   :  { %v2293_v20 = vmul.f32 -1.442695, %v1734_v63 }
 0x37a   :  { %v2294_v21 = vmul.f32 -1.442695, %v1735_v59 }
 0x37b   :  { %2513 = vpow2.f32 %v2293_v20 }
 0x37c   :  { %2515 = vpow2.f32 %v2294_v21  ;;  %v1686_v38 = vpop.f32.mrf.mxu3 }
 0x37d   :  { %v1733_v42 = vadd.f32 %v1686_v38, %v781_v27  ;;  %v1728_v8 = vpop.f32.mrf.mxu2 }
 0x37e   :  { %v1702_v57 = vpop.f32.mrf.mxu0  ;;  %v1736_v39 = vadd.f32 %v1728_v8, %v823_v35 }
 0x37f   :  { %v2292_v61 = vmul.f32 -1.442695, %v1733_v42  ;;  %v1738_v14 = vadd.f32 %v1702_v57, %v797_v40  ;;  %v1716_v15 = vpop.f32.mrf.mxu1 }
 0x380   :  { %v1739_v19 = vadd.f32 %v1716_v15, %v811_v51 }
 0x381   :  { %v2514_v24 = vpop.eup %2513  ;;  %2517 = vpow2.f32 %v2292_v61  ;;  %v2296_v32 = vmul.f32 -1.442695, %v1738_v14 }
 0x382   :  { %v2516_v33 = vpop.eup %2515  ;;  %v1760_v44 = vadd.f32 1.0, %v2514_v24  ;;  %v2297_v9 = vmul.f32 -1.442695, %v1739_v19 }
 0x383   :  { %2519 = vpow2.f32 %v2296_v32  ;;  %v3442_v3 = vadd.f32 1.0, %v2516_v33 }
 0x384   :  { %2521 = vrcp.f32 %v1760_v44  ;;  %v1688_v30 = vpop.f32.mrf.mxu3  ;;  %v1791_v53 = vand.u32 2147483648, %v1760_v44  ;;  %vm1785_vm11 = vweird.f32 %v1760_v44  ;;  %v1789_v60 = vand.u32 2147483647, %v1760_v44 }
 0x385   :  { %v1737_v52 = vadd.f32 %v1688_v30, %v783_v62  ;;  %2523 = vpow2.f32 %v2297_v9  ;;  %v1730_v37 = vpop.f32.mrf.mxu2 }
 0x386   :  { %2525 = vrcp.f32 %v3442_v3  ;;  %v1792_v59 = vor.u32 1.1754944e-38, %v1791_v53  ;;  %v1740_v21 = vadd.f32 %v1730_v37, %v825_v4  ;;  %vm1790_vm0 = vcmp.eq.f32.partialorder %v1789_v60, 8.507059e+37 }
 0x387   :  { %v2518_v45 = vpop.eup %2517  ;;  %v2295_v12 = vmul.f32 -1.442695, %v1737_v52 }
 0x388   :  { %v1759_v10 = vadd.f32 1.0, %v2518_v45  ;;  %v1806_v45 = vand.u32 2147483648, %v3442_v3 }
 0x389   :  { %v2520_v25 = vpop.eup %2519  ;;  %2527 = vpow2.f32 %v2295_v12 }
 0x38a   :  { %v2522_v28 = vpop.eup %2521  ;;  %2529 = vrcp.f32 %v1759_v10  ;;  %v3446_v47 = vadd.f32 1.0, %v2520_v25  ;;  %v1774_v7 = vand.u32 2147483647, %v1759_v10  ;;  %v1776_v11 = vand.u32 2147483648, %v1759_v10 }
 0x38b   :  { %v1781_v23 = vmul.f32 %v2522_v28, %v1760_v44  ;;  %v2524_v34 = vpop.eup %2523  ;;  %vm1786_vm10 = vweird.f32 %v2522_v28  ;;  %vm1770_vm14 = vweird.f32 %v1759_v10 }
 0x38c   :  { %2531 = vrcp.f32 %v3446_v47  ;;  %v3449_v17 = vpop.eup %2525  ;;  %v3452_v48 = vadd.f32 1.0, %v2524_v34  ;;  %vm3463_vm12 = vmor %vm1785_vm11, %vm1786_vm10  ;;  %vm1775_vm15 = vcmp.eq.f32.partialorder %v1774_v7, 8.507059e+37  ;;  %v1777_v40 = vor.u32 1.1754944e-38, %v1776_v11  ;;  %v2392_v11 = vld [vmem:[#allocation2] ss:$0 sm:$0xff] }
 0x38d   :  { %v1782_v36 = vsub.f32 1.0, %v1781_v23  ;;  %v1796_v29 = vmul.f32 %v3449_v17, %v3442_v3  ;;  %vm1830_vm2 = vweird.f32 %v3446_v47  ;;  %v1836_v57 = vand.u32 2147483648, %v3446_v47 }
 0x38e   :  { %2533 = vrcp.f32 %v3452_v48  ;;  %v1834_v9 = vand.u32 2147483647, %v3446_v47  ;;  %vm1801_vm6 = vweird.f32 %v3449_v17  ;;  %vm1800_vm10 = vweird.f32 %v3442_v3 }
 0x38f   :  { %v2528_v18 = vpop.eup %2527  ;;  %v1783_v16 = vmul.f32 %v2522_v28, %v1782_v36  ;;  %v1797_v26 = vsub.f32 1.0, %v1796_v29  ;;  %v1837_v25 = vor.u32 1.1754944e-38, %v1836_v57  ;;  %v1804_v34 = vand.u32 2147483647, %v3442_v3 }
 0x390   :  { %v2530_v50 = vpop.eup %2529  ;;  %v3454_v6 = vadd.f32 1.0, %v2528_v18  ;;  %vm1835_vm8 = vcmp.eq.f32.partialorder %v1834_v9, 8.507059e+37 }
 0x391   :  { %v1766_v1 = vmul.f32 %v2530_v50, %v1759_v10  ;;  %v1784_v55 = vadd.f32 %v2522_v28, %v1783_v16  ;;  %vm1771_vm13 = vweird.f32 %v2530_v50  ;;  %v1798_v24 = vmul.f32 %v3449_v17, %v1797_v26 }
 0x392   :  { %2535 = vrcp.f32 %v3454_v6  ;;  %v3460_v54 = vpop.eup %2531  ;;  %vm1772_vm1 = vmor %vm1770_vm14, %vm1771_vm13  ;;  %v1819_v30 = vand.u32 2147483647, %v3454_v6  ;;  %v1821_v52 = vand.u32 2147483648, %v3454_v6  ;;  %vm1815_vm7 = vweird.f32 %v3454_v6 }
 0x393   :  { %v1767_v41 = vsub.f32 1.0, %v1766_v1  ;;  %2537 = vtanh.f32 %v1736_v39  ;;  %v1826_v13 = vmul.f32 %v3460_v54, %v3446_v47  ;;  %v1788_v31 = vsel %vm3463_vm12, %v2522_v28, %v1784_v55  ;;  %vm1802_vm12 = vmor %vm1800_vm10, %vm1801_vm6  ;;  %v2391_v1 = vld [vmem:[%s3523_s4] ss:$0 sm:$0xff] }
 0x394   :  { %v3471_v27 = vpop.eup %2533  ;;  %v1793_v49 = vsel %vm1790_vm0, %v1792_v59, %v1788_v31  ;;  %vm1831_vm3 = vweird.f32 %v3460_v54  ;;  %2539 = vtanh.f32 %v1740_v21  ;;  %v1799_v8 = vadd.f32 %v3449_v17, %v1798_v24 }
 0x395   :  { %v1768_v63 = vmul.f32 %v2530_v50, %v1767_v41  ;;  %v1827_v20 = vsub.f32 1.0, %v1826_v13  ;;  %v1841_v32 = vmul.f32 %v3471_v27, %v3452_v48  ;;  %v1857_v56 = vmul.f32 %v1793_v49, %v3404_v43  ;;  %vm3486_vm4 = vmor %vm1830_vm2, %vm1831_vm3 }
 0x396   :  { %v1822_v23 = vor.u32 1.1754944e-38, %v1821_v52  ;;  %vm1820_vm11 = vcmp.eq.f32.partialorder %v1819_v30, 8.507059e+37  ;;  %v1803_v18 = vsel %vm1802_vm12, %v3449_v17, %v1799_v8  ;;  %vm1805_vm13 = vcmp.eq.f32.partialorder %v1804_v34, 8.507059e+37 }
 0x397   :  { %v1769_v38 = vadd.f32 %v2530_v50, %v1768_v63  ;;  %v1828_v42 = vmul.f32 %v3460_v54, %v1827_v20  ;;  %v1842_v28 = vsub.f32 1.0, %v1841_v32  ;;  %vm1846_vm14 = vweird.f32 %v3471_v27 }
 0x398   :  { %v2536_v58 = vpop.eup %2535  ;;  %v1851_v17 = vand.u32 2147483648, %v3452_v48  ;;  %vm1883_vm2 = vcmask 7168  }
 0x399   :  { %v1773_v51 = vsel %vm1772_vm1, %v2530_v50, %v1769_v38  ;;  %v1811_v61 = vmul.f32 %v2536_v58, %v3454_v6  ;;  %v2538_v14 = vpop.eup %2537  ;;  %v1829_v19 = vadd.f32 %v3460_v54, %v1828_v42  ;;  %vm1816_vm5 = vweird.f32 %v2536_v58 }
 0x39a   :  { %v1778_v15 = vsel %vm1775_vm15, %v1777_v40, %v1773_v51  ;;  %vm1817_vm9 = vmor %vm1815_vm7, %vm1816_vm5  ;;  %v2540_v2 = vpop.eup %2539  ;;  %v1843_v16 = vmul.f32 %v3471_v27, %v1842_v28  ;;  %v1807_v6 = vor.u32 1.1754944e-38, %v1806_v45  ;;  %vm1845_vm15 = vweird.f32 %v3452_v48 }
 0x39b   :  { %v1859_v33 = vmul.f32 %v2538_v14, %v1778_v15  ;;  %v1812_v44 = vsub.f32 1.0, %v1811_v61  ;;  %v1833_v10 = vsel %vm3486_vm4, %v3460_v54, %v1829_v19  ;;  %vm1847_vm0 = vmor %vm1845_vm15, %vm1846_vm14  ;;  %v1852_v37 = vor.u32 1.1754944e-38, %v1851_v17 }
 0x39c   :  { %v1838_v47 = vsel %vm1835_vm8, %v1837_v25, %v1833_v10  ;;  %v1808_v53 = vsel %vm1805_vm13, %v1807_v6, %v1803_v18  ;;  %v1844_v54 = vadd.f32 %v3471_v27, %v1843_v16 }
 0x39d   :  { %v1813_v12 = vmul.f32 %v2536_v58, %v1812_v44  ;;  %v1861_v43 = vadd.f32 %v1859_v33, %v1857_v56  ;;  %v1858_v50 = vmul.f32 %v1838_v47, %v3413_v22  ;;  %v1849_v22 = vand.u32 2147483647, %v3452_v48 }
 0x39e   :  { %v1848_v7 = vsel %vm1847_vm0, %v3471_v27, %v1844_v54 }
 0x39f   :  { %v1814_v46 = vadd.f32 %v2536_v58, %v1813_v12  ;;  %2541 = vtanh.f32 %v1861_v43  ;;  %vm1850_vm1 = vcmp.eq.f32.partialorder %v1849_v22, 8.507059e+37 }
 0x3a0   :  { %v1853_v0 = vsel %vm1850_vm1, %v1852_v37, %v1848_v7 }
 0x3a1   :  { %v1818_v36 = vsel %vm1817_vm9, %v2536_v58, %v1814_v46 }
 0x3a2   :  { %v1823_v35 = vsel %vm1820_vm11, %v1822_v23, %v1818_v36 }
 0x3a3   :  { %v1860_v39 = vmul.f32 %v2540_v2, %v1823_v35 }
 0x3a5   :  { %v2542_v55 = vpop.eup %2541  ;;  %v1862_v3 = vadd.f32 %v1860_v39, %v1858_v50 }
 0x3a6   :  { %v1865_v29 = vmul.f32 %v2542_v55, %v1808_v53 }
 0x3a7   :  { %2543 = vtanh.f32 %v1862_v3 }
 0x3a8   :  { %v1871_v41 = vmul.f32 %v2391_v1, %v1865_v29 }
 0x3aa   :  { %1873 = vadd.xlane.f32.xlu0 %v1871_v41 }
 0x3ad   :  { %v2544_v60 = vpop.eup %2543 }
 0x3ae   :  { %v1866_v4 = vmul.f32 %v2544_v60, %v1853_v0 }
 0x3b0   :  { %v1872_v5 = vmul.f32 %v2391_v1, %v1866_v4 }
 0x3b2   :  { %1875 = vadd.xlane.f32.xlu0 %v1872_v5 }
 0x41d   :  { %v1874_v13 = vpop.xlane.xlu0 %1873 }
 0x41e   :  { %v1881_v63 = vadd.f32 %v2392_v11, %v1874_v13 }
 0x420   :  { %1884 = vst.msk [vmem:[%s3525_s6] sm:$0xff] %vm1883_vm2, %v1881_v63 }
 0x425   :  { %v1876_v48 = vpop.xlane.xlu0 %1875 }
 0x426   :  { %v1882_v31 = vadd.f32 %v2392_v11, %v1876_v48 }
 0x428   :  { %1885 = vst.msk [vmem:[%s3525_s6 + $0x8] sm:$0xff] %vm1883_vm2, %v1882_v31 }
 0x429   :  { %1890 = vsyncpa [#allocation4], 1 }

</bundles_post_ra>
